<compile_context>
chip_gen: v6e
topology: v6e:2x2x1
jax: 0.10.0
libtpu: 0.0.40
codegen_flags: <defaults>
</compile_context>

<pallas_src>
import functools

import jax
import jax.numpy as jnp
from jax.experimental import pallas as pl
from jax.experimental.pallas import tpu as pltpu

# ---- hyperparameters (match bigram.py) -------------------------------------
BLOCK_SIZE = 32
N_EMB = 64
N_HEAD = 4
NUM_HEADS = N_EMB // N_HEAD      # 16  (because of the swapped ctor args)
HEAD_SIZE = N_HEAD               # 4
FF_HIDDEN = 4 * N_EMB            # 256
EPS = 1e-5                       # torch.nn.LayerNorm default


def _layer_norm(x, gamma, beta):
    mu = jnp.mean(x, axis=-1, keepdims=True)
    var = jnp.mean((x - mu) ** 2, axis=-1, keepdims=True)   # biased, like torch
    return (x - mu) * jax.lax.rsqrt(var + EPS) * gamma + beta


def block_kernel(x_ref, wq_ref, wk_ref, wv_ref, wp_ref, bp_ref,
                 sel_ref, mask_ref,
                 w1_ref, b1_ref, w2_ref, b2_ref,
                 g1_ref, be1_ref, g2_ref, be2_ref, o_ref):
    bt, T, C = x_ref.shape
    X = sel_ref.shape[0]          # H * T   (rows ordered (head, t))
    H = X // T
    M = bt * T                    # fused row count for all dense math

    xf = x_ref[...].reshape(M, C)                     # leading-dim merge only

    # ---- x = ln1(x) ----
    x1 = _layer_norm(xf, g1_ref[...], be1_ref[...])

    # ---- packed QKV: three (M,C)x(C,C) MXU matmuls ----
    # (the C**-0.5 attention scale is pre-folded into wq in the wrapper)
    q = jnp.dot(x1, wq_ref[...], preferred_element_type=jnp.float32)
    k = jnp.dot(x1, wk_ref[...], preferred_element_type=jnp.float32)
    v = jnp.dot(x1, wv_ref[...], preferred_element_type=jnp.float32)

    q3 = q.reshape(bt, T, C)
    k3 = k.reshape(bt, T, C)
    v3 = v.reshape(bt, T, C)

    # ---- attention with heads unrolled onto the row (sublane) axis ----
    # sel[(h,t), c] = 1 iff channel c belongs to head h (same value for all t).
    sel = sel_ref[...]                                     # (X, C)
    sel4 = sel.reshape(H, T, C)                            # leading split only
    # qm[b, (h,t), c] = q[b,t,c] if c in head h else 0
    qm = (q3[:, None, :, :] * sel4[None, :, :, :]).reshape(bt, X, C)

    # raw per-head scores: s[b,(h,t),u] = q_h[b,t] . k_h[b,u]   (one batched dot)
    s = jnp.einsum('bxc,buc->bxu', qm, k3,
                   preferred_element_type=jnp.float32)     # (bt, X, T)
    s = s + mask_ref[...]                                  # causal 0 / -1e30

    # softmax over the key axis (minor axis) - heads handled in one pass
    s = s - jnp.max(s, axis=-1, keepdims=True)
    p = jnp.exp(s)
    denom = jnp.sum(p, axis=-1, keepdims=True)
    p = p * pl.reciprocal(denom, approx=True)              # EUP, not VALU divide

    # weighted values over full C lanes, then keep only head h's column block
    ctx = jnp.einsum('bxu,buc->bxc', p, v3,
                     preferred_element_type=jnp.float32)   # (bt, X, C)
    ctx = (ctx * sel).reshape(bt, H, T, C).sum(axis=1)     # (bt, T, C)

    # "concat heads" is already the lane layout of ctx; one packed projection
    oc = ctx.reshape(M, C)
    sa = jnp.dot(oc, wp_ref[...], preferred_element_type=jnp.float32) + bp_ref[...]

    x2 = x1 + sa                                           # residual off ln1 output

    # ---- x = ln2(x) ----
    x3 = _layer_norm(x2, g2_ref[...], be2_ref[...])

    # ---- feed-forward: Linear -> ReLU -> Linear (dropout p=0.0) ----
    h1 = jnp.dot(x3, w1_ref[...], preferred_element_type=jnp.float32) + b1_ref[...]
    h1 = jnp.maximum(h1, 0.0)
    ff = jnp.dot(h1, w2_ref[...], preferred_element_type=jnp.float32) + b2_ref[...]

    o_ref[...] = (x3 + ff).reshape(bt, T, C)               # residual off ln2 output


def _resident_spec(arr):
    """Constant-index BlockSpec for a weight (no late-bound lambda)."""
    zeros = (0,) * arr.ndim
    return pl.BlockSpec(arr.shape, lambda i, _z=zeros: _z)


def _tpu_vmem_capacity():
    try:
        return int(pltpu.get_tpu_info().vmem_capacity_bytes)
    except Exception:
        return 64 * 1024 * 1024          # conservative (v7x-sized) fallback


def _choose_batch_tile(B, T, vmem_capacity):
    # Target ~512 fused rows/step on 128-MiB-VMEM chips (v5e/v6e), ~256 on v7x.
    target_rows = 512 if vmem_capacity > (64 << 20) else 256
    bt = max(1, min(B, max(1, target_rows // T)))
    # Keep at least 2 "parallel" grid steps when B allows (v7x: 2 TensorCores).
    if B >= 2:
        bt = min(bt, max(1, B // 2))
    while B % bt:                        # make it divide B
        bt -= 1
    return bt


@functools.partial(jax.jit, static_argnames=("batch_tile",))
def block_forward(x, params, batch_tile=None):
    B, T, C = x.shape
    H, D = NUM_HEADS, HEAD_SIZE
    assert C == N_EMB and T % 8 == 0, "T must be a multiple of 8, C == n_emb"

    # fold the (quirky) C**-0.5 score scale into the query projection
    wq_s = params["wq"] * jnp.float32(C ** -0.5)

    # 0/1 head selector with rows ordered (head, t): sel[(h,t), c] = [c//D == h]
    head_of_c = jnp.arange(C) // D
    sel_h = (jnp.arange(H)[:, None] == head_of_c[None, :]).astype(jnp.float32)
    sel = jnp.repeat(sel_h, T, axis=0)                     # (H*T, C)

    # additive causal mask, rows (head, t), lanes = key position u
    tri = jnp.where(jnp.arange(T)[:, None] >= jnp.arange(T)[None, :],
                    0.0, -1e30).astype(jnp.float32)        # (T, T)
    mask = jnp.tile(tri, (H, 1))                           # (H*T, T)

    vmem_cap = _tpu_vmem_capacity()
    bt = batch_tile if batch_tile is not None else _choose_batch_tile(B, T, vmem_cap)
    grid = (B // bt,)

    consts = [wq_s, params["wk"], params["wv"], params["wp"], params["bp"],
              sel, mask,
              params["w1"], params["b1"], params["w2"], params["b2"],
              params["g1"], params["be1"], params["g2"], params["be2"]]

    in_specs = [pl.BlockSpec((bt, T, C), lambda i: (i, 0, 0))]
    in_specs += [_resident_spec(c) for c in consts]

    return pl.pallas_call(
        block_kernel,
        out_shape=jax.ShapeDtypeStruct((B, T, C), jnp.float32),
        grid=grid,
        in_specs=in_specs,
        out_specs=pl.BlockSpec((bt, T, C), lambda i: (i, 0, 0)),
        compiler_params=pltpu.CompilerParams(
            dimension_semantics=("parallel",),
            vmem_limit_bytes=min(64 << 20, max(32 << 20, vmem_cap // 2))),
    )(x, *consts)


# ---- pure-JAX reference (for correctness check) -----------------------------
def block_reference(x, p):
    def ln(y, g, b):
        mu = y.mean(-1, keepdims=True)
        var = ((y - mu) ** 2).mean(-1, keepdims=True)
        return (y - mu) / jnp.sqrt(var + EPS) * g + b

    B, T, C = x.shape
    x1 = ln(x, p["g1"], p["be1"])
    q = x1 @ p["wq"]; k = x1 @ p["wk"]; v = x1 @ p["wv"]
    qh = q.reshape(B, T, NUM_HEADS, HEAD_SIZE)
    kh = k.reshape(B, T, NUM_HEADS, HEAD_SIZE)
    vh = v.reshape(B, T, NUM_HEADS, HEAD_SIZE)
    wei = jnp.einsum('bthd,bshd->bhts', qh, kh) * (N_EMB ** -0.5)
    mask = jnp.tril(jnp.ones((T, T), dtype=bool))
    wei = jnp.where(mask, wei, -jnp.inf)
    wei = jax.nn.softmax(wei, axis=-1)
    out = jnp.einsum('bhts,bshd->bthd', wei, vh).reshape(B, T, C)
    sa = out @ p["wp"] + p["bp"][0]
    x2 = x1 + sa
    x3 = ln(x2, p["g2"], p["be2"])
    ff = jnp.maximum(x3 @ p["w1"] + p["b1"][0], 0.0) @ p["w2"] + p["b2"][0]
    return x3 + ff


def init_params(key):
    ks = jax.random.split(key, 16)
    n = lambda k, shp, s=0.02: (s * jax.random.normal(k, shp)).astype(jnp.float32)
    return {
        # attention (16 heads of size 4, packed along the output axis)
        "wq": n(ks[0], (N_EMB, N_EMB)),
        "wk": n(ks[1], (N_EMB, N_EMB)),
        "wv": n(ks[2], (N_EMB, N_EMB)),
        "wp": n(ks[3], (N_EMB, N_EMB)),
        "bp": n(ks[4], (1, N_EMB)),
        # feed-forward
        "w1": n(ks[5], (N_EMB, FF_HIDDEN)),
        "b1": n(ks[6], (1, FF_HIDDEN)),
        "w2": n(ks[7], (FF_HIDDEN, N_EMB)),
        "b2": n(ks[8], (1, N_EMB)),
        # layernorms (non-trivial affine to exercise the math)
        "g1": (1.0 + n(ks[9], (1, N_EMB))).astype(jnp.float32),
        "be1": n(ks[10], (1, N_EMB)),
        "g2": (1.0 + n(ks[11], (1, N_EMB))).astype(jnp.float32),
        "be2": n(ks[12], (1, N_EMB)),
    }


if __name__ == "__main__":
    key = jax.random.PRNGKey(0)
    kx, kp = jax.random.split(key)

    B, T = 2, 8                                     # T <= block_size (32)
    x = jax.random.normal(kx, (B, T, N_EMB), dtype=jnp.float32)
    params = init_params(kp)

    out = jax.block_until_ready(block_forward(x, params))

    ref = block_reference(x, params)
    assert out.shape == (B, T, N_EMB)
    # tolerance loosened slightly because softmax uses the EUP approximate
    # reciprocal (pl.reciprocal(..., approx=True)); still a tight f32 check.
    assert jnp.allclose(out, ref, atol=2e-3, rtol=2e-3), "mismatch vs reference"

    print("KERNEL_OK")
</pallas_src>

<mosaic_0001>
module attributes {stable_mosaic.version = 11 : i64} {
  func.func @block_kernel(%arg0: i32, %arg1: memref<1x8x64xf32, #tpu.memory_space<vmem>>, %arg2: memref<64x64xf32, #tpu.memory_space<vmem>>, %arg3: memref<64x64xf32, #tpu.memory_space<vmem>>, %arg4: memref<64x64xf32, #tpu.memory_space<vmem>>, %arg5: memref<64x64xf32, #tpu.memory_space<vmem>>, %arg6: memref<1x64xf32, #tpu.memory_space<vmem>>, %arg7: memref<128x64xf32, #tpu.memory_space<vmem>>, %arg8: memref<128x8xf32, #tpu.memory_space<vmem>>, %arg9: memref<64x256xf32, #tpu.memory_space<vmem>>, %arg10: memref<1x256xf32, #tpu.memory_space<vmem>>, %arg11: memref<256x64xf32, #tpu.memory_space<vmem>>, %arg12: memref<1x64xf32, #tpu.memory_space<vmem>>, %arg13: memref<1x64xf32, #tpu.memory_space<vmem>>, %arg14: memref<1x64xf32, #tpu.memory_space<vmem>>, %arg15: memref<1x64xf32, #tpu.memory_space<vmem>>, %arg16: memref<1x64xf32, #tpu.memory_space<vmem>>, %arg17: memref<1x8x64xf32, #tpu.memory_space<vmem>>) attributes {dimension_semantics = [#tpu.dimension_semantics<parallel>], iteration_bounds = array<i64: 2>, scalar_prefetch = 0 : i64, scratch_operands = 0 : i64, tpu.core_type = #tpu.core_type<tc>, window_params = [{transform_indices = @transform_0, window_bounds = array<i64: 1, 8, 64>}, {pipeline_mode = #tpu.pipeline_mode<synchronous>, transform_indices = @transform_1, window_bounds = array<i64: 64, 64>}, {pipeline_mode = #tpu.pipeline_mode<synchronous>, transform_indices = @transform_2, window_bounds = array<i64: 64, 64>}, {pipeline_mode = #tpu.pipeline_mode<synchronous>, transform_indices = @transform_3, window_bounds = array<i64: 64, 64>}, {pipeline_mode = #tpu.pipeline_mode<synchronous>, transform_indices = @transform_4, window_bounds = array<i64: 64, 64>}, {pipeline_mode = #tpu.pipeline_mode<synchronous>, transform_indices = @transform_5, window_bounds = array<i64: 1, 64>}, {pipeline_mode = #tpu.pipeline_mode<synchronous>, transform_indices = @transform_6, window_bounds = array<i64: 128, 64>}, {pipeline_mode = #tpu.pipeline_mode<synchronous>, transform_indices = @transform_7, window_bounds = array<i64: 128, 8>}, {pipeline_mode = #tpu.pipeline_mode<synchronous>, transform_indices = @transform_8, window_bounds = array<i64: 64, 256>}, {pipeline_mode = #tpu.pipeline_mode<synchronous>, transform_indices = @transform_9, window_bounds = array<i64: 1, 256>}, {pipeline_mode = #tpu.pipeline_mode<synchronous>, transform_indices = @transform_10, window_bounds = array<i64: 256, 64>}, {pipeline_mode = #tpu.pipeline_mode<synchronous>, transform_indices = @transform_11, window_bounds = array<i64: 1, 64>}, {pipeline_mode = #tpu.pipeline_mode<synchronous>, transform_indices = @transform_12, window_bounds = array<i64: 1, 64>}, {pipeline_mode = #tpu.pipeline_mode<synchronous>, transform_indices = @transform_13, window_bounds = array<i64: 1, 64>}, {pipeline_mode = #tpu.pipeline_mode<synchronous>, transform_indices = @transform_14, window_bounds = array<i64: 1, 64>}, {pipeline_mode = #tpu.pipeline_mode<synchronous>, transform_indices = @transform_15, window_bounds = array<i64: 1, 64>}, {transform_indices = @transform_16, window_bounds = array<i64: 1, 8, 64>}]} {
    %c0 = arith.constant 0 : index
    %c0_0 = arith.constant 0 : index
    %c0_1 = arith.constant 0 : index
    %0 = vector.load %arg1[%c0, %c0_0, %c0_1] : memref<1x8x64xf32, #tpu.memory_space<vmem>>, vector<1x8x64xf32>
    %1 = vector.shape_cast %0 : vector<1x8x64xf32> to vector<8x64xf32>
    %c0_2 = arith.constant 0 : index
    %c0_3 = arith.constant 0 : index
    %2 = vector.load %arg13[%c0_2, %c0_3] : memref<1x64xf32, #tpu.memory_space<vmem>>, vector<1x64xf32>
    %c0_4 = arith.constant 0 : index
    %c0_5 = arith.constant 0 : index
    %3 = vector.load %arg14[%c0_4, %c0_5] : memref<1x64xf32, #tpu.memory_space<vmem>>, vector<1x64xf32>
    %cst = arith.constant dense<0.000000e+00> : vector<8xf32>
    %4 = vector.multi_reduction <add>, %1, %cst [1] : vector<8x64xf32> to vector<8xf32>
    %5 = vector.shape_cast %4 : vector<8xf32> to vector<8x1xf32>
    %cst_6 = arith.constant 6.400000e+01 : f32
    %6 = vector.broadcast %cst_6 : f32 to vector<8x1xf32>
    %7 = arith.divf %5, %6 : vector<8x1xf32>
    %8 = vector.broadcast %7 : vector<8x1xf32> to vector<8x64xf32>
    %9 = arith.subf %1, %8 : vector<8x64xf32>
    %10 = arith.mulf %9, %9 : vector<8x64xf32>
    %cst_7 = arith.constant dense<0.000000e+00> : vector<8xf32>
    %11 = vector.multi_reduction <add>, %10, %cst_7 [1] : vector<8x64xf32> to vector<8xf32>
    %12 = vector.shape_cast %11 : vector<8xf32> to vector<8x1xf32>
    %cst_8 = arith.constant 6.400000e+01 : f32
    %13 = vector.broadcast %cst_8 : f32 to vector<8x1xf32>
    %14 = arith.divf %12, %13 : vector<8x1xf32>
    %15 = vector.broadcast %7 : vector<8x1xf32> to vector<8x64xf32>
    %16 = arith.subf %1, %15 : vector<8x64xf32>
    %cst_9 = arith.constant 9.99999974E-6 : f32
    %17 = vector.broadcast %cst_9 : f32 to vector<8x1xf32>
    %18 = arith.addf %14, %17 : vector<8x1xf32>
    %19 = math.rsqrt %18 : vector<8x1xf32>
    %20 = vector.broadcast %19 : vector<8x1xf32> to vector<8x64xf32>
    %21 = arith.mulf %16, %20 : vector<8x64xf32>
    %22 = vector.broadcast %2 : vector<1x64xf32> to vector<8x64xf32>
    %23 = arith.mulf %21, %22 : vector<8x64xf32>
    %24 = vector.broadcast %3 : vector<1x64xf32> to vector<8x64xf32>
    %25 = arith.addf %23, %24 : vector<8x64xf32>
    %c0_10 = arith.constant 0 : index
    %c0_11 = arith.constant 0 : index
    %26 = vector.load %arg2[%c0_10, %c0_11] : memref<64x64xf32, #tpu.memory_space<vmem>>, vector<64x64xf32>
    %cst_12 = arith.constant dense<0.000000e+00> : vector<8x64xf32>
    %27 = tpu.matmul %25, %26, %cst_12 {dimension_numbers = #tpu.dot_dimension_numbers<[1], [0], [0], [1], [0, 0, 1, 1], [], []>} : vector<8x64xf32>, vector<64x64xf32>, vector<8x64xf32> -> vector<8x64xf32>
    %c0_13 = arith.constant 0 : index
    %c0_14 = arith.constant 0 : index
    %28 = vector.load %arg3[%c0_13, %c0_14] : memref<64x64xf32, #tpu.memory_space<vmem>>, vector<64x64xf32>
    %cst_15 = arith.constant dense<0.000000e+00> : vector<8x64xf32>
    %29 = tpu.matmul %25, %28, %cst_15 {dimension_numbers = #tpu.dot_dimension_numbers<[1], [0], [0], [1], [0, 0, 1, 1], [], []>} : vector<8x64xf32>, vector<64x64xf32>, vector<8x64xf32> -> vector<8x64xf32>
    %c0_16 = arith.constant 0 : index
    %c0_17 = arith.constant 0 : index
    %30 = vector.load %arg4[%c0_16, %c0_17] : memref<64x64xf32, #tpu.memory_space<vmem>>, vector<64x64xf32>
    %cst_18 = arith.constant dense<0.000000e+00> : vector<8x64xf32>
    %31 = tpu.matmul %25, %30, %cst_18 {dimension_numbers = #tpu.dot_dimension_numbers<[1], [0], [0], [1], [0, 0, 1, 1], [], []>} : vector<8x64xf32>, vector<64x64xf32>, vector<8x64xf32> -> vector<8x64xf32>
    %32 = vector.shape_cast %27 : vector<8x64xf32> to vector<1x8x64xf32>
    %33 = vector.shape_cast %29 : vector<8x64xf32> to vector<1x8x64xf32>
    %34 = vector.shape_cast %31 : vector<8x64xf32> to vector<1x8x64xf32>
    %c0_19 = arith.constant 0 : index
    %c0_20 = arith.constant 0 : index
    %35 = vector.load %arg7[%c0_19, %c0_20] : memref<128x64xf32, #tpu.memory_space<vmem>>, vector<128x64xf32>
    %36 = vector.shape_cast %35 : vector<128x64xf32> to vector<16x8x64xf32>
    %37 = vector.shape_cast %32 : vector<1x8x64xf32> to vector<1x1x8x64xf32>
    %38 = vector.shape_cast %36 : vector<16x8x64xf32> to vector<1x16x8x64xf32>
    %39 = vector.broadcast %37 : vector<1x1x8x64xf32> to vector<1x16x8x64xf32>
    %40 = arith.mulf %39, %38 : vector<1x16x8x64xf32>
    %41 = vector.shape_cast %40 : vector<1x16x8x64xf32> to vector<1x128x64xf32>
    "tpu.trace_start"() <{level = 10 : i32, message = "bxc,buc->bxu"}> : () -> ()
    %cst_21 = arith.constant dense<0.000000e+00> : vector<1x128x8xf32>
    %42 = tpu.matmul %41, %33, %cst_21 {dimension_numbers = #tpu.dot_dimension_numbers<[2], [2], [1], [1], [0, 0, 0, 1, 1, 1], [0], [0]>} : vector<1x128x64xf32>, vector<1x8x64xf32>, vector<1x128x8xf32> -> vector<1x128x8xf32>
    "tpu.trace_stop"() : () -> ()
    %c0_22 = arith.constant 0 : index
    %c0_23 = arith.constant 0 : index
    %43 = vector.load %arg8[%c0_22, %c0_23] : memref<128x8xf32, #tpu.memory_space<vmem>>, vector<128x8xf32>
    %44 = vector.shape_cast %43 : vector<128x8xf32> to vector<1x128x8xf32>
    %45 = arith.addf %42, %44 : vector<1x128x8xf32>
    %cst_24 = arith.constant dense<0xFF800000> : vector<1x128xf32>
    %46 = vector.multi_reduction <maximumf>, %45, %cst_24 [2] : vector<1x128x8xf32> to vector<1x128xf32>
    %47 = vector.shape_cast %46 : vector<1x128xf32> to vector<1x128x1xf32>
    %48 = vector.broadcast %47 : vector<1x128x1xf32> to vector<1x128x8xf32>
    %49 = arith.subf %45, %48 : vector<1x128x8xf32>
    %50 = math.exp %49 : vector<1x128x8xf32>
    %cst_25 = arith.constant dense<0.000000e+00> : vector<1x128xf32>
    %51 = vector.multi_reduction <add>, %50, %cst_25 [2] : vector<1x128x8xf32> to vector<1x128xf32>
    %52 = vector.shape_cast %51 : vector<1x128xf32> to vector<1x128x1xf32>
    %53 = tpu.reciprocal %52 {approx = true} : vector<1x128x1xf32> -> vector<1x128x1xf32>
    %54 = vector.broadcast %53 : vector<1x128x1xf32> to vector<1x128x8xf32>
    %55 = arith.mulf %50, %54 : vector<1x128x8xf32>
    "tpu.trace_start"() <{level = 10 : i32, message = "bxu,buc->bxc"}> : () -> ()
    %cst_26 = arith.constant dense<0.000000e+00> : vector<1x128x64xf32>
    %56 = tpu.matmul %55, %34, %cst_26 {dimension_numbers = #tpu.dot_dimension_numbers<[2], [1], [1], [2], [0, 0, 0, 1, 1, 2], [0], [0]>} : vector<1x128x8xf32>, vector<1x8x64xf32>, vector<1x128x64xf32> -> vector<1x128x64xf32>
    "tpu.trace_stop"() : () -> ()
    %57 = vector.shape_cast %35 : vector<128x64xf32> to vector<1x128x64xf32>
    %58 = arith.mulf %56, %57 : vector<1x128x64xf32>
    %59 = vector.shape_cast %58 : vector<1x128x64xf32> to vector<1x16x8x64xf32>
    %cst_27 = arith.constant dense<0.000000e+00> : vector<1x8x64xf32>
    %60 = vector.multi_reduction <add>, %59, %cst_27 [1] : vector<1x16x8x64xf32> to vector<1x8x64xf32>
    %61 = vector.shape_cast %60 : vector<1x8x64xf32> to vector<8x64xf32>
    %c0_28 = arith.constant 0 : index
    %c0_29 = arith.constant 0 : index
    %62 = vector.load %arg5[%c0_28, %c0_29] : memref<64x64xf32, #tpu.memory_space<vmem>>, vector<64x64xf32>
    %cst_30 = arith.constant dense<0.000000e+00> : vector<8x64xf32>
    %63 = tpu.matmul %61, %62, %cst_30 {dimension_numbers = #tpu.dot_dimension_numbers<[1], [0], [0], [1], [0, 0, 1, 1], [], []>} : vector<8x64xf32>, vector<64x64xf32>, vector<8x64xf32> -> vector<8x64xf32>
    %c0_31 = arith.constant 0 : index
    %c0_32 = arith.constant 0 : index
    %64 = vector.load %arg6[%c0_31, %c0_32] : memref<1x64xf32, #tpu.memory_space<vmem>>, vector<1x64xf32>
    %65 = vector.broadcast %64 : vector<1x64xf32> to vector<8x64xf32>
    %66 = arith.addf %63, %65 : vector<8x64xf32>
    %67 = arith.addf %25, %66 : vector<8x64xf32>
    %c0_33 = arith.constant 0 : index
    %c0_34 = arith.constant 0 : index
    %68 = vector.load %arg15[%c0_33, %c0_34] : memref<1x64xf32, #tpu.memory_space<vmem>>, vector<1x64xf32>
    %c0_35 = arith.constant 0 : index
    %c0_36 = arith.constant 0 : index
    %69 = vector.load %arg16[%c0_35, %c0_36] : memref<1x64xf32, #tpu.memory_space<vmem>>, vector<1x64xf32>
    %cst_37 = arith.constant dense<0.000000e+00> : vector<8xf32>
    %70 = vector.multi_reduction <add>, %67, %cst_37 [1] : vector<8x64xf32> to vector<8xf32>
    %71 = vector.shape_cast %70 : vector<8xf32> to vector<8x1xf32>
    %cst_38 = arith.constant 6.400000e+01 : f32
    %72 = vector.broadcast %cst_38 : f32 to vector<8x1xf32>
    %73 = arith.divf %71, %72 : vector<8x1xf32>
    %74 = vector.broadcast %73 : vector<8x1xf32> to vector<8x64xf32>
    %75 = arith.subf %67, %74 : vector<8x64xf32>
    %76 = arith.mulf %75, %75 : vector<8x64xf32>
    %cst_39 = arith.constant dense<0.000000e+00> : vector<8xf32>
    %77 = vector.multi_reduction <add>, %76, %cst_39 [1] : vector<8x64xf32> to vector<8xf32>
    %78 = vector.shape_cast %77 : vector<8xf32> to vector<8x1xf32>
    %cst_40 = arith.constant 6.400000e+01 : f32
    %79 = vector.broadcast %cst_40 : f32 to vector<8x1xf32>
    %80 = arith.divf %78, %79 : vector<8x1xf32>
    %81 = vector.broadcast %73 : vector<8x1xf32> to vector<8x64xf32>
    %82 = arith.subf %67, %81 : vector<8x64xf32>
    %cst_41 = arith.constant 9.99999974E-6 : f32
    %83 = vector.broadcast %cst_41 : f32 to vector<8x1xf32>
    %84 = arith.addf %80, %83 : vector<8x1xf32>
    %85 = math.rsqrt %84 : vector<8x1xf32>
    %86 = vector.broadcast %85 : vector<8x1xf32> to vector<8x64xf32>
    %87 = arith.mulf %82, %86 : vector<8x64xf32>
    %88 = vector.broadcast %68 : vector<1x64xf32> to vector<8x64xf32>
    %89 = arith.mulf %87, %88 : vector<8x64xf32>
    %90 = vector.broadcast %69 : vector<1x64xf32> to vector<8x64xf32>
    %91 = arith.addf %89, %90 : vector<8x64xf32>
    %c0_42 = arith.constant 0 : index
    %c0_43 = arith.constant 0 : index
    %92 = vector.load %arg9[%c0_42, %c0_43] : memref<64x256xf32, #tpu.memory_space<vmem>>, vector<64x256xf32>
    %cst_44 = arith.constant dense<0.000000e+00> : vector<8x256xf32>
    %93 = tpu.matmul %91, %92, %cst_44 {dimension_numbers = #tpu.dot_dimension_numbers<[1], [0], [0], [1], [0, 0, 1, 1], [], []>} : vector<8x64xf32>, vector<64x256xf32>, vector<8x256xf32> -> vector<8x256xf32>
    %c0_45 = arith.constant 0 : index
    %c0_46 = arith.constant 0 : index
    %94 = vector.load %arg10[%c0_45, %c0_46] : memref<1x256xf32, #tpu.memory_space<vmem>>, vector<1x256xf32>
    %95 = vector.broadcast %94 : vector<1x256xf32> to vector<8x256xf32>
    %96 = arith.addf %93, %95 : vector<8x256xf32>
    %cst_47 = arith.constant 0.000000e+00 : f32
    %97 = vector.broadcast %cst_47 : f32 to vector<8x256xf32>
    %98 = arith.maximumf %96, %97 : vector<8x256xf32>
    %c0_48 = arith.constant 0 : index
    %c0_49 = arith.constant 0 : index
    %99 = vector.load %arg11[%c0_48, %c0_49] : memref<256x64xf32, #tpu.memory_space<vmem>>, vector<256x64xf32>
    %cst_50 = arith.constant dense<0.000000e+00> : vector<8x64xf32>
    %100 = tpu.matmul %98, %99, %cst_50 {dimension_numbers = #tpu.dot_dimension_numbers<[1], [0], [0], [1], [0, 0, 1, 1], [], []>} : vector<8x256xf32>, vector<256x64xf32>, vector<8x64xf32> -> vector<8x64xf32>
    %c0_51 = arith.constant 0 : index
    %c0_52 = arith.constant 0 : index
    %101 = vector.load %arg12[%c0_51, %c0_52] : memref<1x64xf32, #tpu.memory_space<vmem>>, vector<1x64xf32>
    %102 = vector.broadcast %101 : vector<1x64xf32> to vector<8x64xf32>
    %103 = arith.addf %100, %102 : vector<8x64xf32>
    %104 = arith.addf %91, %103 : vector<8x64xf32>
    %105 = vector.shape_cast %104 : vector<8x64xf32> to vector<1x8x64xf32>
    %c0_53 = arith.constant 0 : index
    %c0_54 = arith.constant 0 : index
    %c0_55 = arith.constant 0 : index
    %106 = vector.load %arg17[%c0_53, %c0_54, %c0_55] : memref<1x8x64xf32, #tpu.memory_space<vmem>>, vector<1x8x64xf32>
    tpu.vector_store %arg17[%c0_53, %c0_54, %c0_55], %105 {strides = array<i32>} : memref<1x8x64xf32, #tpu.memory_space<vmem>>, vector<1x8x64xf32>,
    return
  }
  func.func @transform_0(%arg0: i32) -> (i32, i32, i32) {
    %c0_i32 = arith.constant 0 : i32
    %c0_i32_0 = arith.constant 0 : i32
    %c0_i32_1 = arith.constant 0 : i32
    return %arg0, %c0_i32, %c0_i32_0 : i32, i32, i32
  }
  func.func @transform_1(%arg0: i32) -> (i32, i32) {
    %c0_i32 = arith.constant 0 : i32
    %c0_i32_0 = arith.constant 0 : i32
    %c0_i32_1 = arith.constant 0 : i32
    return %c0_i32, %c0_i32_0 : i32, i32
  }
  func.func @transform_2(%arg0: i32) -> (i32, i32) {
    %c0_i32 = arith.constant 0 : i32
    %c0_i32_0 = arith.constant 0 : i32
    %c0_i32_1 = arith.constant 0 : i32
    return %c0_i32, %c0_i32_0 : i32, i32
  }
  func.func @transform_3(%arg0: i32) -> (i32, i32) {
    %c0_i32 = arith.constant 0 : i32
    %c0_i32_0 = arith.constant 0 : i32
    %c0_i32_1 = arith.constant 0 : i32
    return %c0_i32, %c0_i32_0 : i32, i32
  }
  func.func @transform_4(%arg0: i32) -> (i32, i32) {
    %c0_i32 = arith.constant 0 : i32
    %c0_i32_0 = arith.constant 0 : i32
    %c0_i32_1 = arith.constant 0 : i32
    return %c0_i32, %c0_i32_0 : i32, i32
  }
  func.func @transform_5(%arg0: i32) -> (i32, i32) {
    %c0_i32 = arith.constant 0 : i32
    %c0_i32_0 = arith.constant 0 : i32
    %c0_i32_1 = arith.constant 0 : i32
    return %c0_i32, %c0_i32_0 : i32, i32
  }
  func.func @transform_6(%arg0: i32) -> (i32, i32) {
    %c0_i32 = arith.constant 0 : i32
    %c0_i32_0 = arith.constant 0 : i32
    %c0_i32_1 = arith.constant 0 : i32
    return %c0_i32, %c0_i32_0 : i32, i32
  }
  func.func @transform_7(%arg0: i32) -> (i32, i32) {
    %c0_i32 = arith.constant 0 : i32
    %c0_i32_0 = arith.constant 0 : i32
    %c0_i32_1 = arith.constant 0 : i32
    return %c0_i32, %c0_i32_0 : i32, i32
  }
  func.func @transform_8(%arg0: i32) -> (i32, i32) {
    %c0_i32 = arith.constant 0 : i32
    %c0_i32_0 = arith.constant 0 : i32
    %c0_i32_1 = arith.constant 0 : i32
    return %c0_i32, %c0_i32_0 : i32, i32
  }
  func.func @transform_9(%arg0: i32) -> (i32, i32) {
    %c0_i32 = arith.constant 0 : i32
    %c0_i32_0 = arith.constant 0 : i32
    %c0_i32_1 = arith.constant 0 : i32
    return %c0_i32, %c0_i32_0 : i32, i32
  }
  func.func @transform_10(%arg0: i32) -> (i32, i32) {
    %c0_i32 = arith.constant 0 : i32
    %c0_i32_0 = arith.constant 0 : i32
    %c0_i32_1 = arith.constant 0 : i32
    return %c0_i32, %c0_i32_0 : i32, i32
  }
  func.func @transform_11(%arg0: i32) -> (i32, i32) {
    %c0_i32 = arith.constant 0 : i32
    %c0_i32_0 = arith.constant 0 : i32
    %c0_i32_1 = arith.constant 0 : i32
    return %c0_i32, %c0_i32_0 : i32, i32
  }
  func.func @transform_12(%arg0: i32) -> (i32, i32) {
    %c0_i32 = arith.constant 0 : i32
    %c0_i32_0 = arith.constant 0 : i32
    %c0_i32_1 = arith.constant 0 : i32
    return %c0_i32, %c0_i32_0 : i32, i32
  }
  func.func @transform_13(%arg0: i32) -> (i32, i32) {
    %c0_i32 = arith.constant 0 : i32
    %c0_i32_0 = arith.constant 0 : i32
    %c0_i32_1 = arith.constant 0 : i32
    return %c0_i32, %c0_i32_0 : i32, i32
  }
  func.func @transform_14(%arg0: i32) -> (i32, i32) {
    %c0_i32 = arith.constant 0 : i32
    %c0_i32_0 = arith.constant 0 : i32
    %c0_i32_1 = arith.constant 0 : i32
    return %c0_i32, %c0_i32_0 : i32, i32
  }
  func.func @transform_15(%arg0: i32) -> (i32, i32) {
    %c0_i32 = arith.constant 0 : i32
    %c0_i32_0 = arith.constant 0 : i32
    %c0_i32_1 = arith.constant 0 : i32
    return %c0_i32, %c0_i32_0 : i32, i32
  }
  func.func @transform_16(%arg0: i32) -> (i32, i32, i32) {
    %c0_i32 = arith.constant 0 : i32
    %c0_i32_0 = arith.constant 0 : i32
    %c0_i32_1 = arith.constant 0 : i32
    return %arg0, %c0_i32, %c0_i32_0 : i32, i32, i32
  }
}

</mosaic_0001>

<bundles_post_ra>
// kernel: block_forward.1
= control target key start
LH: loop header
LB: loop body
LE: loop exit
PB: predicated region body
PF: predicated region fallthrough
CT: control target
= control target key end

     0   :  { %s3188_s0 = inlined_call_operand.vmem [shape: f32[2,8,64], index: 0, kind: input, shape index: {}]   ;;  %s3189_s1 = inlined_call_operand.vmem [shape: f32[64,64], index: 1, kind: input, shape index: {}]   ;;  %s3190_s2 = inlined_call_operand.vmem [shape: f32[64,64], index: 2, kind: input, shape index: {}]   ;;  %s3191_s3 = inlined_call_operand.vmem [shape: f32[64,64], index: 3, kind: input, shape index: {}]   ;;  %s3192_s4 = inlined_call_operand.vmem [shape: f32[64,64], index: 4, kind: input, shape index: {}]   ;;  %s3193_s5 = inlined_call_operand.vmem [shape: f32[1,64], index: 5, kind: input, shape index: {}]   ;;  %s3194_s6 = inlined_call_operand.vmem [shape: f32[128,64], index: 6, kind: input, shape index: {}]   ;;  %s3195_s7 = inlined_call_operand.vmem [shape: f32[128,8], index: 7, kind: input, shape index: {}]   ;;  %s3196_s8 = inlined_call_operand.vmem [shape: f32[64,256], index: 8, kind: input, shape index: {}]   ;;  %s3197_s9 = inlined_call_operand.vmem [shape: f32[1,256], index: 9, kind: input, shape index: {}]   ;;  %s3198_s10 = inlined_call_operand.vmem [shape: f32[256,64], index: 10, kind: input, shape index: {}]   ;;  %s3199_s11 = inlined_call_operand.vmem [shape: f32[1,64], index: 11, kind: input, shape index: {}]   ;;  %s3200_s12 = inlined_call_operand.vmem [shape: f32[1,64], index: 12, kind: input, shape index: {}]   ;;  %s3201_s13 = inlined_call_operand.vmem [shape: f32[1,64], index: 13, kind: input, shape index: {}]   ;;  %s3202_s14 = inlined_call_operand.vmem [shape: f32[1,64], index: 14, kind: input, shape index: {}]   ;;  %s3203_s15 = inlined_call_operand.vmem [shape: f32[1,64], index: 15, kind: input, shape index: {}]   ;;  %s3204_s16 = inlined_call_operand.hbm [shape: f32[2,8,64], index: 16, kind: output, shape index: {}]  }
   0x1   :  { %3206 = sst [smem:[#allocation7_spill]] %s3188_s0 }
   0x2   :  { %3207 = sst [smem:[#allocation8_spill]] %s3189_s1 }
   0x3   :  { %3208 = sst [smem:[#allocation9_spill]] %s3190_s2 }
   0x4   :  { %3209 = sst [smem:[#allocation10_spill]] %s3191_s3 }
   0x5   :  { %3210 = sst [smem:[#allocation11_spill]] %s3192_s4 }
   0x6   :  { %21 = vsyncpa [#allocation3], 0 }
   0x7   :  { %23 = vsyncpa [#allocation3 + $0x1], 0  ;;  %s2401_s21 = smov 0   ;;  %s2403_s22 = smov 0  }
   0x8   :  { %s2405_s23 = smov 0   ;;  %s2407_s24 = smov 0  }
   0x9 LB: > { %3211 = sst [smem:[#allocation5_spill]] %s2307_s23  ;;  %s2422_s25 = sadd.s32 4294967295, %s2311_s24   ;;  %s2311_s24 = sphi %s2407_s24, %s3224_s24   ;;  %s2307_s23 = sphi %s2405_s23, %s3221_s23   ;;  %s2303_s22 = sphi %s2403_s22, %s3223_s22   ;;  %s2299_s21 = sphi %s2401_s21, %s3222_s21  }
   0xa   : > { %s1853_s26 = sadd.s32 4294967294, %s2311_s24   ;;  %s2426_s27 = sadd.s32 1, %s2311_s24  }
   0xb   : > { %s377_s28 = sadd.s32 1, %s2307_s23  ;;  %s374_s29 = ssub.s32 %s2311_s24, %s2426_s27 }
   0xc   : > { %p387_p0 = scmp.ne.s32.totalorder %s2307_s23, %s2303_s22  ;;  %p375_p1 = scmp.eq.s32.totalorder %s374_s29, 0 }
   0xd   : > { %p388_p2 = scmp.eq.s32.totalorder %s2422_s25, 1  ;;  %p393_p3 = scmp.ne.s32.totalorder %s2303_s22, %s2299_s21 }
   0xe   : > { %p394_p4 = scmp.eq.s32.totalorder %s1853_s26, 1  ;;  %p1856_p7 = scmp.ge.s32.totalorder %s2311_s24, 1 }
   0xf   : > { %s2437_s30 = scalar_select %p375_p1, %s2307_s23, %s377_s28  }
  0x10   : > { %p2439_p5 = por %p388_p2, %p387_p0  ;;  %p2443_p6 = por %p394_p4, %p393_p3 }
  0x11   : > { %3212 = sst [smem:[#allocation6_spill]] %s2437_s30  ;;  %p464_p8 = scmp.lt.s32.totalorder %s2311_s24, 3 }
  0x13   : > { %p465_p9 = pnand %p1856_p7, %p464_p8 }
  0x14   : > { %p513_p10 = scmp.lt.s32.totalorder (!%p465_p9), %s2422_s25, 1  ;;  %s3215_s28 = sld [smem:[#allocation7_spill]] (!%p465_p9) }
  0x15   : > { %468 = sbr.rel (%p465_p9) target bundleno = 2199 (0x897), region = 84  ;;  %s3216_s1 = sld [smem:[#allocation8_spill]] (!%p465_p9) }
  0x16   : > { %s3217_s2 = sld [smem:[#allocation9_spill]] (!%p465_p9)  ;;  %s510_s20 = sand.u32 (!%p465_p9), 1, %s2303_s22  }
  0x17   : > { %s3218_s3 = sld [smem:[#allocation10_spill]] (!%p465_p9)  ;;  %s2315_s23 = smov (!%p465_p9), [#allocation2]  }
  0x18   : > { %s3219_s4 = sld [smem:[#allocation11_spill]] (!%p465_p9)  ;;  %s2255_s26 = sshll.u32 (!%p465_p9), %s2315_s23, 4  ;;  %s2256_s26 = int_to_ptr.vmem [resolvable:$false] %s2255_s26 }
  0x1a   : > { %s514_s18 = scalar_select %p513_p10, %s2422_s25, 1  ;;  %vm520_vm0 = vcmask 523264   ;;  %v2313_v9 = vmov 0.0   ;;  %vm2314_vm1 = vmmov 0   ;;  %v1859_v28 = vld [vmem:[%s3200_s12] ss:$0 sm:$0xff] }
  0x1b   : > { %v556_v7 = vld [vmem:[%s3216_s1 + $0x38] sm:$0xff]  ;;  %2012 = vmatprep.subr.mxu0 %v2313_v9  ;;  %2031 = vmatprep.subr.mxu1 %v2313_v9  ;;  %v555_v10 = vld [vmem:[%s3216_s1 + $0x30] sm:$0xff]  ;;  %v554_v12 = vld [vmem:[%s3216_s1 + $0x28] sm:$0xff]  ;;  %vm1030_vm2 = vcmask 64512  }
  0x1c   : > { %s1858_s19 = sshll.u32 %s514_s18, 3  ;;  %v637_v8 = vld [vmem:[%s3217_s2 + $0x38] sm:$0xff]  ;;  %v636_v11 = vld [vmem:[%s3217_s2 + $0x30] sm:$0xff]  ;;  %2013 = vmatpush3.msra.mxu0 %v556_v7  ;;  %v635_v13 = vld [vmem:[%s3217_s2 + $0x28] sm:$0xff]  ;;  %2028 = vmatprep.mubr.msk.f32.mxu0 %vm2314_vm1, %v2313_v9 }
  0x1d   : > { %s516_s29 = scalar_lea.vmem %s3215_s28, %s1858_s19  ;;  %2032 = vmatpush3.msra.mxu1 %v637_v8  ;;  %2014 = vmatprep.subr.mxu0 %v2313_v9  ;;  %v553_v14 = vld [vmem:[%s3216_s1 + $0x20] sm:$0xff]  ;;  %v552_v16 = vld [vmem:[%s3216_s1 + $0x18] sm:$0xff]  ;;  %v551_v18 = vld [vmem:[%s3216_s1 + $0x10] sm:$0xff]  ;;  %s1857_s19 = sshll.u32 %s510_s20, 3 }
  0x1e   : > { %v517_v0 = vld [vmem:[%s516_s29] sm:$0xff]  ;;  %2033 = vmatprep.subr.mxu1 %v2313_v9  ;;  %2015 = vmatpush3.msra.mxu0 %v555_v10  ;;  %v633_v17 = vld [vmem:[%s3217_s2 + $0x18] sm:$0xff]  ;;  %v632_v19 = vld [vmem:[%s3217_s2 + $0x10] sm:$0xff] }
  0x1f   : > { %v521_v1 = vsel %vm520_vm0, %v517_v0, 0.0  ;;  %2034 = vmatpush3.msra.mxu1 %v636_v11  ;;  %2016 = vmatprep.subr.mxu0 %v2313_v9  ;;  %v634_v15 = vld [vmem:[%s3217_s2 + $0x20] sm:$0xff]  ;;  %v550_v20 = vld [vmem:[%s3216_s1 + $0x8] sm:$0xff]  ;;  %v715_v33 = vld [vmem:[%s3218_s3 + $0x38] sm:$0xff] }
  0x20   : > { %522 = vadd.xlane.f32.xlu0 %v521_v1  ;;  %2035 = vmatprep.subr.mxu1 %v2313_v9  ;;  %v631_v21 = vld [vmem:[%s3217_s2 + $0x8] sm:$0xff]  ;;  %v549_v22 = vld [vmem:[%s3216_s1] sm:$0xff]  ;;  %v714_v34 = vld [vmem:[%s3218_s3 + $0x30] sm:$0xff]  ;;  %s1904_s1 = sshll.u32 %s2422_s25, 7  ;;  %s2257_s25 = scalar_lea.vmem %s2256_s26, 256 }
  0x21   : > { %2017 = vmatpush3.msra.mxu0 %v554_v12  ;;  %2036 = vmatpush3.msra.mxu1 %v635_v13  ;;  %v630_v23 = vld [vmem:[%s3217_s2] sm:$0xff]  ;;  %v713_v35 = vld [vmem:[%s3218_s3 + $0x28] sm:$0xff]  ;;  %v711_v37 = vld [vmem:[%s3218_s3 + $0x18] sm:$0xff]  ;;  %s512_s2 = scalar_lea.vmem [#allocation2], %s1857_s19  ;;  %s1792_s18 = scalar_lea.hbm %s3204_s16, %s1904_s1 }
  0x22   : > { %2018 = vmatprep.subr.mxu0 %v2313_v9  ;;  %2037 = vmatprep.subr.mxu1 %v2313_v9  ;;  %v1860_v30 = vld [vmem:[%s3201_s13] ss:$0 sm:$0xff]  ;;  %v710_v38 = vld [vmem:[%s3218_s3 + $0x10] sm:$0xff]  ;;  %v709_v39 = vld [vmem:[%s3218_s3 + $0x8] sm:$0xff]  ;;  %s1794_s28 = sshll.u32 %s512_s2, 4  ;;  %s1795_s28 = int_to_ptr.vmem [resolvable:$true] %s1794_s28 }
  0x23   : > { %2019 = vmatpush3.msra.mxu0 %v553_v14  ;;  %2038 = vmatpush3.msra.mxu1 %v634_v15  ;;  %v712_v36 = vld [vmem:[%s3218_s3 + $0x20] sm:$0xff]  ;;  %v2590_v45 = vld [vmem:[%s3194_s6 + $0x8] sm:$0xff]  ;;  %v2604_v49 = vld [vmem:[%s3194_s6 + $0x10] sm:$0xff]  ;;  %p2258_p0 = scmp.lt.s32.totalorder %s1795_s28, %s2256_s26 }
  0x24   : > { %2020 = vmatprep.subr.mxu0 %v2313_v9  ;;  %2039 = vmatprep.subr.mxu1 %v2313_v9  ;;  %v708_v40 = vld [vmem:[%s3218_s3] sm:$0xff]  ;;  %v2595_v46 = vld [vmem:[%s3194_s6 + $0x28] sm:$0xff]  ;;  %v2609_v50 = vld [vmem:[%s3194_s6 + $0x30] sm:$0xff]  ;;  %s1781_s3 = scalar_lea.sflag [#allocation3], %s510_s20 }
  0x25   : > { %2021 = vmatpush3.msra.mxu0 %v552_v16  ;;  %2040 = vmatpush3.msra.mxu1 %v633_v17  ;;  %v2580_v41 = vld [vmem:[%s3194_s6] sm:$0xff]  ;;  %v2622_v57 = vld [vmem:[%s3194_s6 + $0x18] sm:$0xff]  ;;  %v2645_v63 = vld [vmem:[%s3194_s6 + $0x48] sm:$0xff] }
  0x26   : > { %2022 = vmatprep.subr.mxu0 %v2313_v9  ;;  %2041 = vmatprep.subr.mxu1 %v2313_v9  ;;  %v2585_v42 = vld [vmem:[%s3194_s6 + $0x20] sm:$0xff]  ;;  %v2627_v58 = vld [vmem:[%s3194_s6 + $0x38] sm:$0xff]  ;;  %v2674_v8 = vld [vmem:[%s3194_s6 + $0x68] sm:$0xff] }
  0x27   : > { %2023 = vmatpush3.msra.mxu0 %v551_v18  ;;  %2042 = vmatpush3.msra.mxu1 %v632_v19  ;;  %v2635_v59 = vld [vmem:[%s3194_s6 + $0x40] sm:$0xff]  ;;  %v2680_v10 = vld [vmem:[%s3194_s6 + $0x70] sm:$0xff]  ;;  %v2688_v14 = vld [vmem:[%s3194_s6 + $0x78] sm:$0xff] }
  0x28   : > { %2024 = vmatprep.subr.mxu0 %v2313_v9  ;;  %2043 = vmatprep.subr.mxu1 %v2313_v9  ;;  %v818_v18 = vld [vmem:[%s3195_s7] sm:$0xff]  ;;  %v819_v19 = vld [vmem:[%s3195_s7 + $0x8] sm:$0xff] }
  0x29   : > { %2025 = vmatpush3.msra.mxu0 %v550_v20  ;;  %2044 = vmatpush3.msra.mxu1 %v631_v21 }
  0x2a   : > { %2026 = vmatprep.subr.mxu0 %v2313_v9  ;;  %2045 = vmatprep.subr.mxu1 %v2313_v9 }
  0x2b   : > { %2027 = vmatpush3.msra.mxu0 %v549_v22  ;;  %2046 = vmatpush3.msra.mxu1 %v630_v23 }
  0x2c   : > { %2047 = vmatprep.mubr.msk.f32.mxu1 %vm2314_vm1, %v2313_v9  ;;  %2050 = vmatprep.subr.mxu0 %v2313_v9 }
  0xa9   : > { %v523_v2 = vpop.xlane.xlu0 %522 }
  0xaa   : > { %v525_v3 = vmul.f32 0.015625, %v523_v2 }
  0xac   : > { %v2455_v4 = vsub.f32 %v517_v0, %v525_v3  ;;  %v2652_v0 = vld [vmem:[%s3194_s6 + $0x50] sm:$0xff]  ;;  %v2660_v3 = vld [vmem:[%s3194_s6 + $0x58] sm:$0xff] }
  0xae   : > { %v527_v5 = vmul.f32 %v2455_v4, %v2455_v4 }
  0xb0   : > { %v528_v6 = vsel %vm520_vm0, %v527_v5, 0.0 }
  0xb1   : > { %529 = vadd.xlane.f32.xlu0 %v528_v6 }
 0x13a   : > { %v530_v24 = vpop.xlane.xlu0 %529 }
 0x13b   : > { %v531_v25 = vmul.f32 0.015625, %v530_v24 }
 0x13d   : > { %v532_v26 = vadd.f32 1e-05, %v531_v25  ;;  %v820_v25 = vld [vmem:[%s3195_s7 + $0x10] sm:$0xff] }
 0x13f   : > { %2183 = vrsqrt.f32 %v532_v26 }
 0x14c   : > { %v2184_v27 = vpop.eup %2183 }
 0x14d   : > { %v534_v29 = vmul.f32 %v2184_v27, %v2455_v4  ;;  %v2666_v4 = vld [vmem:[%s3194_s6 + $0x60] sm:$0xff] }
 0x14f   : > { %v541_v31 = vmul.f32 %v1859_v28, %v534_v29  ;;  %v822_v28 = vld [vmem:[%s3195_s7 + $0x20] sm:$0xff]  ;;  %v821_v29 = vld [vmem:[%s3195_s7 + $0x18] sm:$0xff] }
 0x151   : > { %v2536_v32 = vadd.f32 %v1860_v30, %v541_v31 }
 0x153   : > { %2029 = vmatmul.mubr.msk.f32.vlgmr.msra.gmra.mxu0 %vm520_vm0, %v2536_v32  ;;  %2048 = vmatmul.mubr.msk.f32.vlgmr.msra.gmra.mxu1 %vm520_vm0, %v2536_v32 }
 0x154   : > { %2051 = vmatpush3.msra.mxu0 %v715_v33  ;;  %2066 = vmatprep.mubr.msk.f32.mxu0 %vm2314_vm1, %v2313_v9 }
 0x155   : > { %2052 = vmatprep.subr.mxu0 %v2313_v9 }
 0x156   : > { %2053 = vmatpush3.msra.mxu0 %v714_v34 }
 0x157   : > { %2054 = vmatprep.subr.mxu0 %v2313_v9 }
 0x158   : > { %2055 = vmatpush3.msra.mxu0 %v713_v35 }
 0x159   : > { %2056 = vmatprep.subr.mxu0 %v2313_v9 }
 0x15a   : > { %2057 = vmatpush3.msra.mxu0 %v712_v36 }
 0x15b   : > { %2058 = vmatprep.subr.mxu0 %v2313_v9 }
 0x15c   : > { %2059 = vmatpush3.msra.mxu0 %v711_v37 }
 0x15d   : > { %2060 = vmatprep.subr.mxu0 %v2313_v9 }
 0x15e   : > { %2061 = vmatpush3.msra.mxu0 %v710_v38 }
 0x15f   : > { %2062 = vmatprep.subr.mxu0 %v2313_v9 }
 0x160   : > { %2063 = vmatpush3.msra.mxu0 %v709_v39  ;;  %v823_v39 = vld [vmem:[%s3195_s7 + $0x28] sm:$0xff] }
 0x161   : > { %2064 = vmatprep.subr.mxu0 %v2313_v9 }
 0x162   : > { %2065 = vmatpush3.msra.mxu0 %v708_v40  ;;  %v824_v40 = vld [vmem:[%s3195_s7 + $0x30] sm:$0xff] }
 0x163   : > { %2067 = vmatmul.mubr.msk.f32.vlgmr.msra.gmra.mxu0 %vm520_vm0, %v2536_v32 }
 0x213   : > { %v626_v43 = vpop.f32.mrf.mxu0  ;;  %v704_v44 = vpop.f32.mrf.mxu1 }
 0x214   : > { %2069 = vmatprep.subr.msk.mxu0 %vm520_vm0, %v704_v44  ;;  %2140 = vmatprep.subr.msk.mxu1 %vm520_vm0, %v704_v44  ;;  %v802_v47 = vmul.f32 %v2580_v41, %v626_v43  ;;  %v806_v48 = vmul.f32 %v2585_v42, %v626_v43  ;;  %v803_v53 = vmul.f32 %v2590_v45, %v626_v43 }
 0x215   : > { %v2030_v51 = vpop.f32.mrf.mxu0  ;;  %v2049_v52 = vpop.f32.mrf.mxu1  ;;  %2070 = vmatpush3.xpose.msk.msra.mxu0 %vm520_vm0, %v704_v44  ;;  %2141 = vmatpush3.xpose.msk.msra.mxu1 %vm520_vm0, %v704_v44  ;;  %v807_v54 = vmul.f32 %v2595_v46, %v626_v43  ;;  %v804_v55 = vmul.f32 %v2604_v49, %v626_v43  ;;  %v808_v56 = vmul.f32 %v2609_v50, %v626_v43 }
 0x216   : > { %2071 = vmatprep.mubr.msk.f32.mxu0 %vm520_vm0, %v802_v47  ;;  %2077 = vmatprep.mubr.msk.f32.mxu1 %vm520_vm0, %v806_v48  ;;  %v805_v60 = vmul.f32 %v2622_v57, %v626_v43  ;;  %v809_v61 = vmul.f32 %v2627_v58, %v626_v43  ;;  %v810_v62 = vmul.f32 %v2635_v59, %v626_v43 }
 0x217   : > { %2121 = vmatprep.subr.mxu1 %v2313_v9  ;;  %v811_v1 = vmul.f32 %v2645_v63, %v626_v43  ;;  %v812_v2 = vmul.f32 %v2652_v0, %v626_v43  ;;  %v813_v5 = vmul.f32 %v2660_v3, %v626_v43  ;;  %v814_v7 = vmul.f32 %v2666_v4, %v626_v43 }
 0x218   : > { %2072 = vmatmul.mubr.msk.f32.vlgmr.msra.gmra.mxu0 %vm520_vm0, %v803_v53  ;;  %2078 = vmatmul.mubr.msk.f32.vlgmr.msra.gmra.mxu1 %vm520_vm0, %v807_v54  ;;  %v815_v12 = vmul.f32 %v2674_v8, %v626_v43  ;;  %v816_v13 = vmul.f32 %v2680_v10, %v626_v43  ;;  %v817_v15 = vmul.f32 %v2688_v14, %v626_v43  ;;  %v825_v53 = vld [vmem:[%s3195_s7 + $0x38] sm:$0xff]  ;;  %v826_v54 = vld [vmem:[%s3195_s7 + $0x40] sm:$0xff] }
 0x219   : > { %2074 = vmatprep.mubr.msk.f32.mxu0 %vm520_vm0, %v804_v55  ;;  %2080 = vmatprep.mubr.msk.f32.mxu1 %vm520_vm0, %v808_v56 }
 0x21c   : > { %2075 = vmatmul.mubr.msk.f32.gmra.mxu0 %vm520_vm0, %v805_v60  ;;  %2081 = vmatmul.mubr.msk.f32.gmra.mxu1 %vm520_vm0, %v809_v61 }
 0x21d   : > { %2083 = vmatprep.mubr.msk.f32.mxu1 %vm520_vm0, %v810_v62 }
 0x220   : > { %2084 = vmatmul.mubr.msk.f32.gmra.mxu1 %vm520_vm0, %v811_v1 }
 0x221   : > { %2086 = vmatprep.mubr.msk.f32.mxu1 %vm520_vm0, %v812_v2  ;;  %v827_v2 = vld [vmem:[%s3195_s7 + $0x48] sm:$0xff] }
 0x223   : > { %v782_v6 = vpop.f32.mrf.mxu0 }
 0x224   : > { %2095 = vmatprep.subr.mxu0 %v782_v6  ;;  %2087 = vmatmul.mubr.msk.f32.gmra.mxu1 %vm520_vm0, %v813_v5  ;;  %v828_v5 = vld [vmem:[%s3195_s7 + $0x50] sm:$0xff] }
 0x225   : > { %v2068_v11 = vpop.f32.mrf.mxu0  ;;  %2096 = vmatpush3.msra.mxu0 %v782_v6  ;;  %2089 = vmatprep.mubr.msk.f32.mxu1 %vm520_vm0, %v814_v7 }
 0x228   : > { %2090 = vmatmul.mubr.msk.f32.gmra.mxu1 %vm520_vm0, %v815_v12 }
 0x229   : > { %2092 = vmatprep.mubr.msk.f32.mxu1 %vm520_vm0, %v816_v13 }
 0x22c   : > { %2093 = vmatmul.mubr.msk.f32.gmra.mxu1 %vm520_vm0, %v817_v15  ;;  %v829_v15 = vld [vmem:[%s3195_s7 + $0x58] sm:$0xff] }
 0x22d   : > { %2137 = vmatprep.mubr.msk.f32.mxu1 %vm2314_vm1, %v2313_v9 }
 0x2d8   : > { %v2073_v16 = vpop.f32.mrf.mxu0  ;;  %v2079_v17 = vpop.f32.mrf.mxu1 }
 0x2d9   : > { %v2707_v26 = vadd.f32 %v2073_v16, %v819_v19  ;;  %v2733_v47 = vadd.f32 %v2079_v17, %v823_v39  ;;  %v830_v16 = vld [vmem:[%s3195_s7 + $0x60] sm:$0xff] }
 0x2da   : > { %v951_v20 = vpop.f32.mrf.mxu0  ;;  %v971_v21 = vpop.f32.mrf.mxu1 }
 0x2db   : > { %v2702_v22 = vadd.f32 %v951_v20, %v818_v18  ;;  %v2719_v35 = vadd.f32 %v971_v21, %v822_v28  ;;  %v1034_v38 = vsel %vm1030_vm2, %v2707_v26, -inf  ;;  %v1046_v1 = vsel %vm1030_vm2, %v2733_v47, -inf }
 0x2dc   : > { %v2076_v23 = vpop.f32.mrf.mxu0  ;;  %v2082_v24 = vpop.f32.mrf.mxu1 }
 0x2dd   : > { %v1031_v27 = vsel %vm1030_vm2, %v2702_v22, -inf  ;;  %v2721_v36 = vadd.f32 %v2076_v23, %v821_v29  ;;  %v1043_v51 = vsel %vm1030_vm2, %v2719_v35, -inf  ;;  %v2747_v60 = vadd.f32 %v2082_v24, %v825_v53  ;;  %v831_v23 = vld [vmem:[%s3195_s7 + $0x68] sm:$0xff] }
 0x2de   : > { %v961_v30 = vpop.f32.mrf.mxu0  ;;  %v981_v31 = vpop.f32.mrf.mxu1  ;;  %1032 = vmax.xlane.f32.xlu1 %v1031_v27 }
 0x2df   : > { %v2717_v33 = vadd.f32 %v961_v30, %v820_v25  ;;  %v2735_v48 = vadd.f32 %v981_v31, %v824_v40  ;;  %v1040_v52 = vsel %vm1030_vm2, %v2721_v36, -inf  ;;  %v1052_v13 = vsel %vm1030_vm2, %v2747_v60, -inf  ;;  %v832_v25 = vld [vmem:[%s3195_s7 + $0x70] sm:$0xff]  ;;  %v833_v31 = vld [vmem:[%s3195_s7 + $0x78] sm:$0xff] }
 0x2e0   : > { %v2085_v34 = vpop.f32.mrf.mxu1 }
 0x2e1   : > { %v1037_v37 = vsel %vm1030_vm2, %v2717_v33, -inf  ;;  %v1049_v62 = vsel %vm1030_vm2, %v2735_v48, -inf  ;;  %v2761_v7 = vadd.f32 %v2085_v34, %v827_v2 }
 0x2e2   : > { %v991_v43 = vpop.f32.mrf.mxu1  ;;  %1038 = vmax.xlane.f32.xlu0 %v1037_v37  ;;  %1035 = vmax.xlane.f32.xlu1 %v1034_v38 }
 0x2e3   : > { %v2749_v61 = vadd.f32 %v991_v43, %v826_v54  ;;  %v1058_v21 = vsel %vm1030_vm2, %v2761_v7, -inf }
 0x2e4   : > { %v2088_v44 = vpop.f32.mrf.mxu1 }
 0x2e5   : > { %v1055_v12 = vsel %vm1030_vm2, %v2749_v61, -inf  ;;  %v2775_v18 = vadd.f32 %v2088_v44, %v829_v15 }
 0x2e6   : > { %v1001_v55 = vpop.f32.mrf.mxu1  ;;  %1044 = vmax.xlane.f32.xlu0 %v1043_v51  ;;  %1041 = vmax.xlane.f32.xlu1 %v1040_v52 }
 0x2e7   : > { %v2763_v11 = vadd.f32 %v1001_v55, %v828_v5  ;;  %v1064_v30 = vsel %vm1030_vm2, %v2775_v18, -inf }
 0x2e8   : > { %v2091_v56 = vpop.f32.mrf.mxu1 }
 0x2e9   : > { %v1061_v20 = vsel %vm1030_vm2, %v2763_v11, -inf  ;;  %v2789_v27 = vadd.f32 %v2091_v56, %v831_v23 }
 0x2ea   : > { %v1011_v6 = vpop.f32.mrf.mxu1  ;;  %1050 = vmax.xlane.f32.xlu0 %v1049_v62  ;;  %1047 = vmax.xlane.f32.xlu1 %v1046_v1 }
 0x2eb   : > { %v2777_v19 = vadd.f32 %v1011_v6, %v830_v16  ;;  %v1070_v38 = vsel %vm1030_vm2, %v2789_v27, -inf }
 0x2ec   : > { %v2094_v17 = vpop.f32.mrf.mxu1 }
 0x2ed   : > { %v1067_v29 = vsel %vm1030_vm2, %v2777_v19, -inf  ;;  %v2800_v34 = vadd.f32 %v2094_v17, %v833_v31 }
 0x2ee   : > { %1056 = vmax.xlane.f32.xlu0 %v1055_v12  ;;  %1053 = vmax.xlane.f32.xlu1 %v1052_v13  ;;  %v1021_v24 = vpop.f32.mrf.mxu1 }
 0x2ef   : > { %v2791_v28 = vadd.f32 %v1021_v24, %v832_v25  ;;  %v1076_v39 = vsel %vm1030_vm2, %v2800_v34, -inf }
 0x2f1   : > { %v1073_v37 = vsel %vm1030_vm2, %v2791_v28, -inf }
 0x2f2   : > { %1062 = vmax.xlane.f32.xlu0 %v1061_v20  ;;  %1059 = vmax.xlane.f32.xlu1 %v1058_v21 }
 0x2f6   : > { %1068 = vmax.xlane.f32.xlu0 %v1067_v29  ;;  %1065 = vmax.xlane.f32.xlu1 %v1064_v30 }
 0x2fa   : > { %1074 = vmax.xlane.f32.xlu0 %v1073_v37  ;;  %1071 = vmax.xlane.f32.xlu1 %v1070_v38 }
 0x2fe   : > { %1077 = vmax.xlane.f32.xlu1 %v1076_v39 }
 0x367   : > { %v1033_v40 = vpop.xlane.xlu1 %1032 }
 0x368   : > { %v1079_v43 = vsub.f32 %v2702_v22, %v1033_v40 }
 0x36a   : > { %v1095_v44 = vmul.f32 1.442695, %v1079_v43 }
 0x36b   : > { %v1039_v51 = vpop.xlane.xlu0 %1038  ;;  %v1036_v52 = vpop.xlane.xlu1 %1035 }
 0x36c   : > { %2185 = vpow2.f32 %v1095_v44  ;;  %v1081_v53 = vsub.f32 %v2717_v33, %v1039_v51  ;;  %v1080_v54 = vsub.f32 %v2707_v26, %v1036_v52 }
 0x36e   : > { %v1099_v55 = vmul.f32 1.442695, %v1081_v53  ;;  %v1097_v56 = vmul.f32 1.442695, %v1080_v54 }
 0x36f   : > { %v1045_v62 = vpop.xlane.xlu0 %1044  ;;  %v1042_v1 = vpop.xlane.xlu1 %1041 }
 0x370   : > { %2187 = vpow2.f32 %v1099_v55  ;;  %v1083_v2 = vsub.f32 %v2719_v35, %v1045_v62  ;;  %v1082_v5 = vsub.f32 %v2721_v36, %v1042_v1 }
 0x371   : > { %2189 = vpow2.f32 %v1097_v56 }
 0x372   : > { %v1103_v6 = vmul.f32 1.442695, %v1083_v2  ;;  %v1101_v22 = vmul.f32 1.442695, %v1082_v5 }
 0x373   : > { %v1051_v12 = vpop.xlane.xlu0 %1050  ;;  %v1048_v13 = vpop.xlane.xlu1 %1047 }
 0x374   : > { %2191 = vpow2.f32 %v1103_v6  ;;  %v1085_v15 = vsub.f32 %v2735_v48, %v1051_v12  ;;  %v1084_v33 = vsub.f32 %v2733_v47, %v1048_v13 }
 0x375   : > { %2193 = vpow2.f32 %v1101_v22 }
 0x376   : > { %v1107_v26 = vmul.f32 1.442695, %v1085_v15  ;;  %v1105_v16 = vmul.f32 1.442695, %v1084_v33 }
 0x377   : > { %v1057_v17 = vpop.xlane.xlu0 %1056  ;;  %v1054_v20 = vpop.xlane.xlu1 %1053 }
 0x378   : > { %2195 = vpow2.f32 %v1107_v26  ;;  %v1087_v35 = vsub.f32 %v2749_v61, %v1057_v17  ;;  %v1086_v36 = vsub.f32 %v2747_v60, %v1054_v20 }
 0x379   : > { %v2817_v21 = vpop.eup %2185  ;;  %2197 = vpow2.f32 %v1105_v16 }
 0x37a   : > { %v1111_v23 = vmul.f32 1.442695, %v1087_v35  ;;  %v1109_v24 = vmul.f32 1.442695, %v1086_v36  ;;  %v1127_v48 = vsel %vm1030_vm2, %v2817_v21, 0.0 }
 0x37b   : > { %v1063_v25 = vpop.xlane.xlu0 %1062  ;;  %1128 = vadd.xlane.f32.xlu0 %v1127_v48  ;;  %v1060_v47 = vpop.xlane.xlu1 %1059 }
 0x37c   : > { %2199 = vpow2.f32 %v1111_v23  ;;  %v1089_v29 = vsub.f32 %v2763_v11, %v1063_v25  ;;  %v1088_v30 = vsub.f32 %v2761_v7, %v1060_v47 }
 0x37d   : > { %v2823_v31 = vpop.eup %2187  ;;  %2201 = vpow2.f32 %v1109_v24 }
 0x37e   : > { %v2825_v60 = vpop.eup %2189  ;;  %v1115_v61 = vmul.f32 1.442695, %v1089_v29  ;;  %v1113_v37 = vmul.f32 1.442695, %v1088_v30  ;;  %v1133_v38 = vsel %vm1030_vm2, %v2823_v31, 0.0 }
 0x37f   : > { %v1069_v39 = vpop.xlane.xlu0 %1068  ;;  %1134 = vadd.xlane.f32.xlu0 %v1133_v38  ;;  %v1130_v40 = vsel %vm1030_vm2, %v2825_v60, 0.0  ;;  %v1066_v43 = vpop.xlane.xlu1 %1065 }
 0x380   : > { %2203 = vpow2.f32 %v1115_v61  ;;  %v1091_v11 = vsub.f32 %v2777_v19, %v1069_v39  ;;  %1131 = vadd.xlane.f32.xlu1 %v1130_v40  ;;  %v1090_v7 = vsub.f32 %v2775_v18, %v1066_v43 }
 0x381   : > { %v2833_v44 = vpop.eup %2191  ;;  %2205 = vpow2.f32 %v1113_v37 }
 0x382   : > { %v2835_v51 = vpop.eup %2193  ;;  %v1119_v52 = vmul.f32 1.442695, %v1091_v11  ;;  %v1117_v53 = vmul.f32 1.442695, %v1090_v7  ;;  %v1139_v54 = vsel %vm1030_vm2, %v2833_v44, 0.0 }
 0x383   : > { %v1075_v55 = vpop.xlane.xlu0 %1074  ;;  %1140 = vadd.xlane.f32.xlu0 %v1139_v54  ;;  %v1136_v56 = vsel %vm1030_vm2, %v2835_v51, 0.0  ;;  %v1072_v62 = vpop.xlane.xlu1 %1071 }
 0x384   : > { %2207 = vpow2.f32 %v1119_v52  ;;  %v1093_v19 = vsub.f32 %v2791_v28, %v1075_v55  ;;  %1137 = vadd.xlane.f32.xlu1 %v1136_v56  ;;  %v1092_v18 = vsub.f32 %v2789_v27, %v1072_v62 }
 0x385   : > { %v2843_v1 = vpop.eup %2195  ;;  %2209 = vpow2.f32 %v1117_v53 }
 0x386   : > { %v2845_v2 = vpop.eup %2197  ;;  %v1123_v5 = vmul.f32 1.442695, %v1093_v19  ;;  %v1121_v6 = vmul.f32 1.442695, %v1092_v18  ;;  %v1145_v22 = vsel %vm1030_vm2, %v2843_v1, 0.0 }
 0x387   : > { %1146 = vadd.xlane.f32.xlu0 %v1145_v22  ;;  %v1142_v12 = vsel %vm1030_vm2, %v2845_v2, 0.0  ;;  %v1078_v13 = vpop.xlane.xlu1 %1077 }
 0x388   : > { %2211 = vpow2.f32 %v1123_v5  ;;  %1143 = vadd.xlane.f32.xlu1 %v1142_v12  ;;  %v1094_v28 = vsub.f32 %v2800_v34, %v1078_v13 }
 0x389   : > { %v2852_v27 = vpop.eup %2199  ;;  %2213 = vpow2.f32 %v1121_v6 }
 0x38a   : > { %v2854_v15 = vpop.eup %2201  ;;  %v1125_v33 = vmul.f32 1.442695, %v1094_v28  ;;  %v1151_v26 = vsel %vm1030_vm2, %v2852_v27, 0.0 }
 0x38b   : > { %1152 = vadd.xlane.f32.xlu0 %v1151_v26  ;;  %v1148_v16 = vsel %vm1030_vm2, %v2854_v15, 0.0 }
 0x38c   : > { %2215 = vpow2.f32 %v1125_v33  ;;  %1149 = vadd.xlane.f32.xlu1 %v1148_v16 }
 0x38d   : > { %v2860_v17 = vpop.eup %2203 }
 0x38e   : > { %v2862_v20 = vpop.eup %2205  ;;  %v1157_v34 = vsel %vm1030_vm2, %v2860_v17, 0.0 }
 0x38f   : > { %1158 = vadd.xlane.f32.xlu0 %v1157_v34  ;;  %v1154_v35 = vsel %vm1030_vm2, %v2862_v20, 0.0 }
 0x390   : > { %1155 = vadd.xlane.f32.xlu1 %v1154_v35 }
 0x391   : > { %v2868_v36 = vpop.eup %2207 }
 0x392   : > { %v2870_v23 = vpop.eup %2209  ;;  %v1163_v24 = vsel %vm1030_vm2, %v2868_v36, 0.0 }
 0x393   : > { %1164 = vadd.xlane.f32.xlu0 %v1163_v24  ;;  %v1160_v48 = vsel %vm1030_vm2, %v2870_v23, 0.0 }
 0x394   : > { %1161 = vadd.xlane.f32.xlu1 %v1160_v48 }
 0x395   : > { %v2876_v25 = vpop.eup %2211 }
 0x396   : > { %v2878_v47 = vpop.eup %2213  ;;  %v1169_v29 = vsel %vm1030_vm2, %v2876_v25, 0.0 }
 0x397   : > { %1170 = vadd.xlane.f32.xlu0 %v1169_v29  ;;  %v1166_v30 = vsel %vm1030_vm2, %v2878_v47, 0.0 }
 0x398   : > { %1167 = vadd.xlane.f32.xlu1 %v1166_v30 }
 0x399   : > { %v2884_v61 = vpop.eup %2215 }
 0x39a   : > { %v1172_v37 = vsel %vm1030_vm2, %v2884_v61, 0.0 }
 0x39c   : > { %1173 = vadd.xlane.f32.xlu1 %v1172_v37 }
 0x404   : > { %v1129_v38 = vpop.xlane.xlu0 %1128 }
 0x405   : > { %2217 = vrcp.f32 %v1129_v38 }
 0x408   : > { %v1135_v39 = vpop.xlane.xlu0 %1134 }
 0x409   : > { %2219 = vrcp.f32 %v1135_v39  ;;  %v1132_v40 = vpop.xlane.xlu1 %1131 }
 0x40a   : > { %2221 = vrcp.f32 %v1132_v40 }
 0x40c   : > { %v1141_v43 = vpop.xlane.xlu0 %1140 }
 0x40d   : > { %2223 = vrcp.f32 %v1141_v43  ;;  %v1138_v11 = vpop.xlane.xlu1 %1137 }
 0x40e   : > { %2225 = vrcp.f32 %v1138_v11 }
 0x410   : > { %v1147_v7 = vpop.xlane.xlu0 %1146 }
 0x411   : > { %2227 = vrcp.f32 %v1147_v7  ;;  %v1144_v52 = vpop.xlane.xlu1 %1143 }
 0x412   : > { %v2218_v53 = vpop.eup %2217  ;;  %2229 = vrcp.f32 %v1144_v52 }
 0x413   : > { %v1191_v54 = vmul.f32 %v2218_v53, %v2817_v21  ;;  %v1449_v53 = vld [vmem:[%s3219_s4 + $0x10] sm:$0xff] }
 0x414   : > { %v1153_v55 = vpop.xlane.xlu0 %1152 }
 0x415   : > { %2231 = vrcp.f32 %v1153_v55  ;;  %v1150_v56 = vpop.xlane.xlu1 %1149  ;;  %2097 = vmatprep.mubr.msk.f32.mxu0 %vm1030_vm2, %v1191_v54  ;;  %v1448_v54 = vld [vmem:[%s3219_s4 + $0x8] sm:$0xff]  ;;  %v1447_v55 = vld [vmem:[%s3219_s4] sm:$0xff] }
 0x416   : > { %v2220_v62 = vpop.eup %2219  ;;  %2233 = vrcp.f32 %v1150_v56 }
 0x417   : > { %v2222_v19 = vpop.eup %2221  ;;  %v1193_v18 = vmul.f32 %v2220_v62, %v2823_v31 }
 0x418   : > { %v1192_v5 = vmul.f32 %v2222_v19, %v2825_v60  ;;  %v1159_v6 = vpop.xlane.xlu0 %1158 }
 0x419   : > { %2235 = vrcp.f32 %v1159_v6  ;;  %v1156_v22 = vpop.xlane.xlu1 %1155 }
 0x41a   : > { %v2224_v12 = vpop.eup %2223  ;;  %2237 = vrcp.f32 %v1156_v22  ;;  %2098 = vmatmul.mubr.msk.f32.vlgmr.msra.gmra.mxu0 %vm1030_vm2, %v1192_v5 }
 0x41b   : > { %v2226_v21 = vpop.eup %2225  ;;  %2100 = vmatprep.mubr.msk.f32.mxu0 %vm1030_vm2, %v1193_v18  ;;  %v1195_v13 = vmul.f32 %v2224_v12, %v2833_v44 }
 0x41c   : > { %v1165_v28 = vpop.xlane.xlu0 %1164  ;;  %v1194_v33 = vmul.f32 %v2226_v21, %v2835_v51 }
 0x41d   : > { %2239 = vrcp.f32 %v1165_v28  ;;  %v1162_v26 = vpop.xlane.xlu1 %1161 }
 0x41e   : > { %v2228_v31 = vpop.eup %2227  ;;  %2241 = vrcp.f32 %v1162_v26  ;;  %2101 = vmatmul.mubr.msk.f32.gmra.mxu0 %vm1030_vm2, %v1194_v33 }
 0x41f   : > { %v2230_v60 = vpop.eup %2229  ;;  %2103 = vmatprep.mubr.msk.f32.mxu0 %vm1030_vm2, %v1195_v13  ;;  %v1197_v16 = vmul.f32 %v2228_v31, %v2843_v1 }
 0x420   : > { %v1171_v34 = vpop.xlane.xlu0 %1170  ;;  %v1196_v35 = vmul.f32 %v2230_v60, %v2845_v2 }
 0x421   : > { %2243 = vrcp.f32 %v1171_v34  ;;  %v1168_v24 = vpop.xlane.xlu1 %1167 }
 0x422   : > { %v2232_v44 = vpop.eup %2231  ;;  %2245 = vrcp.f32 %v1168_v24  ;;  %2104 = vmatmul.mubr.msk.f32.gmra.mxu0 %vm1030_vm2, %v1196_v35 }
 0x423   : > { %v2234_v51 = vpop.eup %2233  ;;  %2106 = vmatprep.mubr.msk.f32.mxu0 %vm1030_vm2, %v1197_v16  ;;  %v1199_v48 = vmul.f32 %v2232_v44, %v2852_v27 }
 0x424   : > { %v1198_v29 = vmul.f32 %v2234_v51, %v2854_v15 }
 0x425   : > { %v1174_v30 = vpop.xlane.xlu1 %1173 }
 0x426   : > { %v2236_v37 = vpop.eup %2235  ;;  %2247 = vrcp.f32 %v1174_v30  ;;  %2107 = vmatmul.mubr.msk.f32.gmra.mxu0 %vm1030_vm2, %v1198_v29 }
 0x427   : > { %v2238_v1 = vpop.eup %2237  ;;  %2109 = vmatprep.mubr.msk.f32.mxu0 %vm1030_vm2, %v1199_v48  ;;  %v1201_v2 = vmul.f32 %v2236_v37, %v2860_v17 }
 0x428   : > { %v1200_v38 = vmul.f32 %v2238_v1, %v2862_v20 }
 0x42a   : > { %v2240_v39 = vpop.eup %2239  ;;  %2110 = vmatmul.mubr.msk.f32.gmra.mxu0 %vm1030_vm2, %v1200_v38 }
 0x42b   : > { %v2242_v40 = vpop.eup %2241  ;;  %2112 = vmatprep.mubr.msk.f32.mxu0 %vm1030_vm2, %v1201_v2  ;;  %v1203_v27 = vmul.f32 %v2240_v39, %v2868_v36  ;;  %v1454_v36 = vld [vmem:[%s3219_s4 + $0x38] sm:$0xff] }
 0x42c   : > { %v1202_v15 = vmul.f32 %v2242_v40, %v2870_v23  ;;  %2122 = vmatpush3.msra.mxu1 %v1454_v36  ;;  %v1453_v23 = vld [vmem:[%s3219_s4 + $0x30] sm:$0xff] }
 0x42d   : > { %2123 = vmatprep.subr.mxu1 %v2313_v9 }
 0x42e   : > { %v2244_v43 = vpop.eup %2243  ;;  %2113 = vmatmul.mubr.msk.f32.gmra.mxu0 %vm1030_vm2, %v1202_v15  ;;  %2124 = vmatpush3.msra.mxu1 %v1453_v23 }
 0x42f   : > { %v2246_v11 = vpop.eup %2245  ;;  %2115 = vmatprep.mubr.msk.f32.mxu0 %vm1030_vm2, %v1203_v27  ;;  %v1205_v17 = vmul.f32 %v2244_v43, %v2876_v25  ;;  %v1452_v25 = vld [vmem:[%s3219_s4 + $0x28] sm:$0xff]  ;;  %2125 = vmatprep.subr.mxu1 %v2313_v9 }
 0x430   : > { %v1204_v20 = vmul.f32 %v2246_v11, %v2878_v47  ;;  %2126 = vmatpush3.msra.mxu1 %v1452_v25  ;;  %v1451_v47 = vld [vmem:[%s3219_s4 + $0x20] sm:$0xff] }
 0x431   : > { %2127 = vmatprep.subr.mxu1 %v2313_v9 }
 0x432   : > { %2116 = vmatmul.mubr.msk.f32.gmra.mxu0 %vm1030_vm2, %v1204_v20  ;;  %2128 = vmatpush3.msra.mxu1 %v1451_v47 }
 0x433   : > { %v2248_v7 = vpop.eup %2247  ;;  %2118 = vmatprep.mubr.msk.f32.mxu0 %vm1030_vm2, %v1205_v17  ;;  %2129 = vmatprep.subr.mxu1 %v2313_v9 }
 0x434   : > { %v1206_v52 = vmul.f32 %v2248_v7, %v2884_v61  ;;  %v1450_v61 = vld [vmem:[%s3219_s4 + $0x18] sm:$0xff]  ;;  %s2251_s4 = scalar_lea.vmem %s1795_s28, 128 }
 0x435   : > { %2130 = vmatpush3.msra.mxu1 %v1450_v61  ;;  %p2252_p11 = scmp.ne.s32.totalorder %s1795_s28, %s2251_s4  ;;  %p2259_p1 = scmp.lt.s32.totalorder %s2257_s25, %s2251_s4 }
 0x436   : > { %2119 = vmatmul.mubr.msk.f32.gmra.mxu0 %vm1030_vm2, %v1206_v52  ;;  %2131 = vmatprep.subr.mxu1 %v2313_v9 }
 0x437   : > { %1660 = vmatprep.mubr.f32.mxu0 %v2313_v9  ;;  %2132 = vmatpush3.msra.mxu1 %v1449_v53  ;;  %p2253_p12 = pnand %p2252_p11, %p2439_p5  ;;  %p2260_p2 = por %p2259_p1, %p2258_p0 }
 0x438   : > { %2133 = vmatprep.subr.mxu1 %v2313_v9 }
 0x439   : > { %2134 = vmatpush3.msra.mxu1 %v1448_v54  ;;  %p2254_p13 = pneg %p2253_p12 }
 0x43a   : > { %2135 = vmatprep.subr.mxu1 %v2313_v9 }
 0x43b   : > { %2136 = vmatpush3.msra.mxu1 %v1447_v55  ;;  %p2261_p3 = pnand %p2260_p2, %p2254_p13 }
 0x4da   : > { %v2099_v56 = vpop.f32.mrf.mxu0 }
 0x4db   : > { %v1401_v19 = vmul.f32 %v2099_v56, %v2590_v45 }
 0x4dc   : > { %v1321_v62 = vpop.f32.mrf.mxu0 }
 0x4dd   : > { %v1400_v18 = vmul.f32 %v1321_v62, %v2580_v41  ;;  %v1417_v12 = vsel %vm520_vm0, %v1401_v19, 0.0 }
 0x4de   : > { %v2102_v5 = vpop.f32.mrf.mxu0 }
 0x4df   : > { %v1416_v6 = vsel %vm520_vm0, %v1400_v18, 0.0  ;;  %v1403_v21 = vmul.f32 %v2102_v5, %v2622_v57 }
 0x4e0   : > { %v1331_v22 = vpop.f32.mrf.mxu0  ;;  %v1418_v28 = vadd.f32 %v1417_v12, %v1416_v6  ;;  %v1579_v12 = vld [vmem:[%s3196_s8 + $0x70] sm:$0xff] }
 0x4e1   : > { %v1402_v13 = vmul.f32 %v1331_v22, %v2604_v49  ;;  %v1421_v45 = vsel %vm520_vm0, %v1403_v21, 0.0  ;;  %v1580_v22 = vld [vmem:[%s3196_s8 + $0x78] sm:$0xff]  ;;  %v1578_v21 = vld [vmem:[%s3196_s8 + $0x68] sm:$0xff] }
 0x4e2   : > { %v2105_v33 = vpop.f32.mrf.mxu0  ;;  %1612 = vmatprep.subr.mxu0 %v1580_v22 }
 0x4e3   : > { %v1419_v9 = vsel %vm520_vm0, %v1402_v13, 0.0  ;;  %v1405_v41 = vmul.f32 %v2105_v33, %v2595_v46  ;;  %1613 = vmatpush1.msra.mxu0 %v1579_v12  ;;  %v1581_v12 = vld [vmem:[%s3197_s9] sm:$0x3] }
 0x4e4   : > { %v1420_v26 = vadd.f32 %v1419_v9, %v1418_v28  ;;  %v1341_v31 = vpop.f32.mrf.mxu0  ;;  %1614 = vmatprep.subr.mxu0 %v1578_v21 }
 0x4e5   : > { %v1404_v60 = vmul.f32 %v1341_v31, %v2585_v42  ;;  %v1425_v49 = vsel %vm520_vm0, %v1405_v41, 0.0  ;;  %v1576_v31 = vld [vmem:[%s3196_s8 + $0x58] sm:$0xff]  ;;  %v1574_v41 = vld [vmem:[%s3196_s8 + $0x48] sm:$0xff] }
 0x4e6   : > { %v1422_v16 = vadd.f32 %v1421_v45, %v1420_v26  ;;  %v2108_v34 = vpop.f32.mrf.mxu0  ;;  %v1575_v45 = vld [vmem:[%s3196_s8 + $0x50] sm:$0xff] }
 0x4e7   : > { %v1423_v35 = vsel %vm520_vm0, %v1404_v60, 0.0  ;;  %v1407_v44 = vmul.f32 %v2108_v34, %v2627_v58  ;;  %v1573_v60 = vld [vmem:[%s3196_s8 + $0x40] sm:$0xff]  ;;  %v1571_v34 = vld [vmem:[%s3196_s8 + $0x30] sm:$0xff] }
 0x4e8   : > { %v1424_v24 = vadd.f32 %v1423_v35, %v1422_v16  ;;  %v1351_v57 = vpop.f32.mrf.mxu0  ;;  %v1572_v16 = vld [vmem:[%s3196_s8 + $0x38] sm:$0xff]  ;;  %v1570_v35 = vld [vmem:[%s3196_s8 + $0x28] sm:$0xff] }
 0x4e9   : > { %v1406_v51 = vmul.f32 %v1351_v57, %v2609_v50  ;;  %v1429_v42 = vsel %vm520_vm0, %v1407_v44, 0.0  ;;  %v1568_v57 = vld [vmem:[%s3196_s8 + $0x18] sm:$0xff]  ;;  %v1566_v44 = vld [vmem:[%s3196_s8 + $0x8] sm:$0xff] }
 0x4ea   : > { %v1426_v48 = vadd.f32 %v1425_v49, %v1424_v24  ;;  %v2111_v29 = vpop.f32.mrf.mxu0  ;;  %v1569_v24 = vld [vmem:[%s3196_s8 + $0x20] sm:$0xff]  ;;  %v1567_v49 = vld [vmem:[%s3196_s8 + $0x10] sm:$0xff] }
 0x4eb   : > { %v1427_v30 = vsel %vm520_vm0, %v1406_v51, 0.0  ;;  %v1409_v1 = vmul.f32 %v2111_v29, %v2645_v63  ;;  %v1565_v51 = vld [vmem:[%s3196_s8] sm:$0xff]  ;;  %v1684_v29 = vld [vmem:[%s3198_s10 + $0x78] sm:$0xff] }
 0x4ec   : > { %v1428_v37 = vadd.f32 %v1427_v30, %v1426_v48  ;;  %v1361_v46 = vpop.f32.mrf.mxu0  ;;  %v1700_v48 = vld [vmem:[%s3198_s10 + $0xf8] sm:$0xff]  ;;  %v1699_v30 = vld [vmem:[%s3198_s10 + $0xf0] sm:$0xff] }
 0x4ed   : > { %v1408_v2 = vmul.f32 %v1361_v46, %v2635_v59  ;;  %v1433_v50 = vsel %vm520_vm0, %v1409_v1, 0.0  ;;  %1977 = vmatprep.subr.mxu1 %v1700_v48  ;;  %v1698_v46 = vld [vmem:[%s3198_s10 + $0xe8] sm:$0xff]  ;;  %v1697_v1 = vld [vmem:[%s3198_s10 + $0xe0] sm:$0xff] }
 0x4ee   : > { %v1430_v38 = vadd.f32 %v1429_v42, %v1428_v37  ;;  %v2114_v39 = vpop.f32.mrf.mxu0  ;;  %v1683_v37 = vld [vmem:[%s3198_s10 + $0x70] sm:$0xff]  ;;  %v1682_v42 = vld [vmem:[%s3198_s10 + $0x68] sm:$0xff] }
 0x4ef   : > { %v1431_v40 = vsel %vm520_vm0, %v1408_v2, 0.0  ;;  %v1411_v15 = vmul.f32 %v2114_v39, %v2660_v3  ;;  %v1681_v2 = vld [vmem:[%s3198_s10 + $0x60] sm:$0xff]  ;;  %v1680_v39 = vld [vmem:[%s3198_s10 + $0x58] sm:$0xff] }
 0x4f0   : > { %v1432_v27 = vadd.f32 %v1431_v40, %v1430_v38  ;;  %v1371_v58 = vpop.f32.mrf.mxu0  ;;  %v1696_v38 = vld [vmem:[%s3198_s10 + $0xd8] sm:$0xff]  ;;  %v1695_v40 = vld [vmem:[%s3198_s10 + $0xd0] sm:$0xff] }
 0x4f1   : > { %v1410_v43 = vmul.f32 %v1371_v58, %v2652_v0  ;;  %v1437_v59 = vsel %vm520_vm0, %v1411_v15, 0.0  ;;  %v1694_v58 = vld [vmem:[%s3198_s10 + $0xc8] sm:$0xff]  ;;  %v1693_v15 = vld [vmem:[%s3198_s10 + $0xc0] sm:$0xff] }
 0x4f2   : > { %v1434_v11 = vadd.f32 %v1433_v50, %v1432_v27  ;;  %v2117_v17 = vpop.f32.mrf.mxu0  ;;  %v1679_v27 = vld [vmem:[%s3198_s10 + $0x50] sm:$0xff]  ;;  %v1678_v50 = vld [vmem:[%s3198_s10 + $0x48] sm:$0xff] }
 0x4f3   : > { %v1435_v20 = vsel %vm520_vm0, %v1410_v43, 0.0  ;;  %v1413_v52 = vmul.f32 %v2117_v17, %v2674_v8  ;;  %v1677_v43 = vld [vmem:[%s3198_s10 + $0x40] sm:$0xff]  ;;  %v1676_v17 = vld [vmem:[%s3198_s10 + $0x38] sm:$0xff] }
 0x4f4   : > { %v1436_v7 = vadd.f32 %v1435_v20, %v1434_v11  ;;  %v1381_v63 = vpop.f32.mrf.mxu0  ;;  %v1692_v11 = vld [vmem:[%s3198_s10 + $0xb8] sm:$0xff]  ;;  %v1691_v20 = vld [vmem:[%s3198_s10 + $0xb0] sm:$0xff] }
 0x4f5   : > { %v1412_v36 = vmul.f32 %v1381_v63, %v2666_v4  ;;  %v1441_v0 = vsel %vm520_vm0, %v1413_v52, 0.0  ;;  %v1897_v4 = vld [vmem:[%s3193_s5] ss:$0 sm:$0xff]  ;;  %v1690_v63 = vld [vmem:[%s3198_s10 + $0xa8] sm:$0xff] }
 0x4f6   : > { %v1438_v23 = vadd.f32 %v1437_v59, %v1436_v7  ;;  %v2120_v25 = vpop.f32.mrf.mxu0  ;;  %v1675_v7 = vld [vmem:[%s3198_s10 + $0x30] sm:$0xff]  ;;  %v1674_v59 = vld [vmem:[%s3198_s10 + $0x28] sm:$0xff]  ;;  %v1689_v52 = vld [vmem:[%s3198_s10 + $0xa0] sm:$0xff] }
 0x4f7   : > { %v1439_v47 = vsel %vm520_vm0, %v1412_v36, 0.0  ;;  %v1415_v53 = vmul.f32 %v2120_v25, %v2688_v14  ;;  %v1673_v36 = vld [vmem:[%s3198_s10 + $0x20] sm:$0xff] }
 0x4f8   : > { %v1440_v61 = vadd.f32 %v1439_v47, %v1438_v23  ;;  %v1391_v3 = vpop.f32.mrf.mxu0 }
 0x4f9   : > { %v1414_v54 = vmul.f32 %v1391_v3, %v2680_v10  ;;  %v1445_v8 = vsel %vm520_vm0, %v1415_v53, 0.0  ;;  %v1899_v3 = vld [vmem:[%s3202_s14] ss:$0 sm:$0xff] }
 0x4fa   : > { %v1442_v55 = vadd.f32 %v1441_v0, %v1440_v61  ;;  %v1900_v53 = vld [vmem:[%s3203_s15] ss:$0 sm:$0xff] }
 0x4fb   : > { %v1443_v56 = vsel %vm520_vm0, %v1414_v54, 0.0 }
 0x4fc   : > { %v1444_v62 = vadd.f32 %v1443_v56, %v1442_v55  ;;  %v1688_v56 = vld [vmem:[%s3198_s10 + $0x98] sm:$0xff] }
 0x4fe   : > { %v1446_v19 = vadd.f32 %v1445_v8, %v1444_v62  ;;  %v1672_v62 = vld [vmem:[%s3198_s10 + $0x18] sm:$0xff]  ;;  %v1687_v8 = vld [vmem:[%s3198_s10 + $0x90] sm:$0xff] }
 0x500   : > { %2138 = vmatmul.mubr.msk.f32.vlgmr.msra.gmra.mxu1 %vm520_vm0, %v1446_v19  ;;  %v1671_v19 = vld [vmem:[%s3198_s10 + $0x10] sm:$0xff] }
 0x501   : > { %1978 = vmatpush3.msra.mxu1 %v1684_v29 }
 0x502   : > { %1979 = vmatprep.subr.mxu1 %v1699_v30 }
 0x503   : > { %1980 = vmatpush3.msra.mxu1 %v1683_v37 }
 0x504   : > { %1981 = vmatprep.subr.mxu1 %v1698_v46 }
 0x505   : > { %1982 = vmatpush3.msra.mxu1 %v1682_v42 }
 0x506   : > { %1983 = vmatprep.subr.mxu1 %v1697_v1 }
 0x507   : > { %1984 = vmatpush3.msra.mxu1 %v1681_v2 }
 0x508   : > { %1985 = vmatprep.subr.mxu1 %v1696_v38 }
 0x509   : > { %1986 = vmatpush3.msra.mxu1 %v1680_v39 }
 0x50a   : > { %1987 = vmatprep.subr.mxu1 %v1695_v40 }
 0x50b   : > { %1988 = vmatpush3.msra.mxu1 %v1679_v27 }
 0x50c   : > { %1989 = vmatprep.subr.mxu1 %v1694_v58 }
 0x50d   : > { %1990 = vmatpush3.msra.mxu1 %v1678_v50 }
 0x50e   : > { %1991 = vmatprep.subr.mxu1 %v1693_v15 }
 0x50f   : > { %1992 = vmatpush3.msra.mxu1 %v1677_v43 }
 0x510   : > { %1993 = vmatprep.subr.mxu1 %v1692_v11 }
 0x511   : > { %1994 = vmatpush3.msra.mxu1 %v1676_v17 }
 0x512   : > { %1995 = vmatprep.subr.mxu1 %v1691_v20 }
 0x513   : > { %1996 = vmatpush3.msra.mxu1 %v1675_v7 }
 0x514   : > { %1997 = vmatprep.subr.mxu1 %v1690_v63 }
 0x515   : > { %1998 = vmatpush3.msra.mxu1 %v1674_v59 }
 0x516   : > { %1999 = vmatprep.subr.mxu1 %v1689_v52 }
 0x517   : > { %2000 = vmatpush3.msra.mxu1 %v1673_v36 }
 0x518   : > { %2001 = vmatprep.subr.mxu1 %v1688_v56 }
 0x519   : > { %2002 = vmatpush3.msra.mxu1 %v1672_v62 }
 0x51a   : > { %2003 = vmatprep.subr.mxu1 %v1687_v8 }
 0x51b   : > { %2004 = vmatpush3.msra.mxu1 %v1671_v19 }
 0x5c0   : > { %v1531_v18 = vpop.f32.mrf.mxu1 }
 0x5c1   : > { %v1532_v5 = vadd.f32 %v1897_v4, %v1531_v18  ;;  %v1686_v4 = vld [vmem:[%s3198_s10 + $0x88] sm:$0xff] }
 0x5c2   : > { %v2139_v6 = vpop.f32.mrf.mxu1  ;;  %v1670_v18 = vld [vmem:[%s3198_s10 + $0x8] sm:$0xff]  ;;  %2005 = vmatprep.subr.mxu1 %v1686_v4 }
 0x5c3   : > { %v1535_v14 = vadd.f32 %v1532_v5, %v2536_v32  ;;  %v1577_v32 = vld [vmem:[%s3196_s8 + $0x60] sm:$0xff]  ;;  %2006 = vmatpush3.msra.mxu1 %v1670_v18 }
 0x5c4   : > { %1615 = vmatpush1.msra.mxu0 %v1577_v32  ;;  %v1685_v5 = vld [vmem:[%s3198_s10 + $0x80] sm:$0xff] }
 0x5c5   : > { %v1538_v10 = vsel %vm520_vm0, %v1535_v14, 0.0  ;;  %1616 = vmatprep.subr.mxu0 %v1576_v31  ;;  %v1669_v6 = vld [vmem:[%s3198_s10] sm:$0xff]  ;;  %2007 = vmatprep.subr.mxu1 %v1685_v5 }
 0x5c6   : > { %1539 = vadd.xlane.f32.xlu0 %v1538_v10  ;;  %1617 = vmatpush1.msra.mxu0 %v1575_v45 }
 0x5c7   : > { %1618 = vmatprep.subr.mxu0 %v1574_v41  ;;  %2008 = vmatpush3.msra.mxu1 %v1669_v6 }
 0x5c8   : > { %1619 = vmatpush1.msra.mxu0 %v1573_v60  ;;  %v1902_v60 = vld [vmem:[%s3199_s11] ss:$0 sm:$0xff] }
 0x5c9   : > { %1620 = vmatprep.subr.mxu0 %v1572_v16 }
 0x5ca   : > { %1621 = vmatpush1.msra.mxu0 %v1571_v34 }
 0x5cb   : > { %1622 = vmatprep.subr.mxu0 %v1570_v35 }
 0x5cc   : > { %1623 = vmatpush1.msra.mxu0 %v1569_v24 }
 0x5cd   : > { %1624 = vmatprep.subr.mxu0 %v1568_v57 }
 0x5ce   : > { %1625 = vmatpush1.msra.mxu0 %v1567_v49 }
 0x5cf   : > { %1626 = vmatprep.subr.mxu0 %v1566_v44 }
 0x5d0   : > { %1627 = vmatpush1.msra.mxu0 %v1565_v51 }
 0x64f   : > { %v1540_v13 = vpop.xlane.xlu0 %1539 }
 0x650   : > { %v1541_v28 = vmul.f32 0.015625, %v1540_v13 }
 0x652   : > { %v3002_v33 = vsub.f32 %v1535_v14, %v1541_v28  ;;  %v1583_v14 = vlaneseq }
 0x654   : > { %v1543_v9 = vmul.f32 %v3002_v33, %v3002_v33  ;;  %v1584_v10 = vshrl.u32 %v1583_v14, 7 }
 0x656   : > { %v1544_v26 = vsel %vm520_vm0, %v1543_v9, 0.0  ;;  %v1585_v22 = vsub.s32 0, %v1584_v10  ;;  %v1589_v21 = vsub.s32 1, %v1584_v10 }
 0x657   : > { %1545 = vadd.xlane.f32.xlu1 %v1544_v26 }
 0x658   : > { %v1586_v32 = vrot.slane %v1581_v12, %v1585_v22  ;;  %v1590_v13 = vrot.slane %v1581_v12, %v1589_v21 }
 0x6e0   : > { %v1546_v23 = vpop.xlane.xlu1 %1545 }
 0x6e1   : > { %v1547_v25 = vmul.f32 0.015625, %v1546_v23 }
 0x6e3   : > { %v1548_v47 = vadd.f32 1e-05, %v1547_v25 }
 0x6e5   : > { %2249 = vrsqrt.f32 %v1548_v47 }
 0x6f2   : > { %v2250_v61 = vpop.eup %2249 }
 0x6f3   : > { %v1550_v0 = vmul.f32 %v2250_v61, %v3002_v33 }
 0x6f5   : > { %v1557_v54 = vmul.f32 %v1899_v3, %v1550_v0 }
 0x6f7   : > { %v1564_v55 = vadd.f32 %v1900_v53, %v1557_v54 }
 0x6f9   : > { %1901 = vmatmul.mubr.msk.f32.vlgmr.msra.gmra.mxu0 %vm520_vm0, %v1564_v55 }
 0x7b9   : > { %v1662_v28 = vpop.f32.mrf.mxu0 }
 0x7ba   : > { %v1663_v33 = vadd.f32 %v1662_v28, %v1586_v32 }
 0x7bb   : > { %v1664_v9 = vpop.f32.mrf.mxu0 }
 0x7bc   : > { %v1665_v26 = vadd.f32 %v1664_v9, %v1590_v13  ;;  %v1667_v45 = vmax.f32 %v1663_v33, 0.0 }
 0x7be   : > { %v1668_v31 = vmax.f32 %v1665_v26, 0.0 }
 0x7c0   : > { %1772 = vmatprep.mubr.f32.mxu1 %v1668_v31 }
 0x7c1   : > { %1773 = vmatmul.mubr.f32.vlgmr.msra.gmra.mxu1 %v1667_v45 }
 0x881   : > { %v2009_v41 = vpop.f32.mrf.mxu1 }
 0x883   : > { %v2010_v16 = vpop.f32.mrf.mxu1 }
 0x884   : > { %v2011_v34 = vadd.f32 %v2010_v16, %v2009_v41 }
 0x886   : > { %v1775_v35 = vadd.f32 %v2011_v34, %v1902_v60 }
 0x888   : > { %v1778_v24 = vadd.f32 %v1775_v35, %v1564_v55 }
 0x88a   : > { %1779 = vst.msk [vmem:[%s512_s2] sm:$0xff] %vm520_vm0, %v1778_v24 }
 0x88b   : > { %2264 = shalt.err (!%p2261_p3)
}
 0x88c   : > { %s2265_s19 = scalar_lea.hbm %s1792_s18, 128  ;;  %s2269_s2 = scalar_lea.hbm %s3204_s16, 256 }
 0x88d   : > { %p2266_p4 = scmp.ne.s32.totalorder %s1792_s18, %s2265_s19  ;;  %p2270_p9 = scmp.lt.s32.totalorder %s1792_s18, %s3204_s16 }
 0x88e   : > { %p2271_p10 = scmp.lt.s32.totalorder %s2269_s2, %s2265_s19 }
 0x88f   : > { %p2267_p7 = pnand %p2266_p4, %p2439_p5 }
 0x890   : > { %p2272_p11 = por %p2271_p10, %p2270_p9 }
 0x891   : > { %p2268_p8 = pneg %p2267_p7 }
 0x893   : > { %p2273_p12 = pnand %p2272_p11, %p2268_p8 }
 0x895   : > { %2276 = shalt.err (!%p2273_p12)
}
 0x896   : > { %2142 = dma.vmem_to_hbm [thread:$0]  (%p2439_p5), %s1795_s28, 128, %s1792_s18, %s1781_s3  }
 0x897 PF: > { %p2148_p13 = scmp.ge.s32.totalorder %s2311_s24, 2  ;;  %s1806_s4 = sand.u32 1, %s2299_s21  }
 0x898   : > { %s1807_s23 = scalar_lea.sflag [#allocation3], %s1806_s4 }
 0x899   : > { %p2145_p0 = pnand %p2148_p13, %p2443_p6 }
 0x89b   : > { %p2146_p1 = pneg %p2145_p0 }
 0x89d   : > { %2294 = dma.done.wait (%p2146_p1), %s1807_s23, 128  }
 0x89e   : > { %2296 = vsyncadd (%p2146_p1), %s1807_s23, 4294967168  ;;  %s3220_s26 = sld [smem:[#allocation5_spill]]  ;;  %p26_p2 = scmp.ge.s32.totalorder %s2426_s27, 4  }
 0x89f   : > { %s3221_s23 = sld [smem:[#allocation6_spill]]  ;;  %s3222_s21 = smov %s2303_s22 }
 0x8a0   : > { %s3224_s24 = smov %s2426_s27  ;;  %28 = sbr.rel (!%p26_p2) target bundleno = 9 (0x9), region = 119 }
 0x8a4   : > { %s3223_s22 = smov %s3220_s26 }
 0x8a5   :  { %1812 = vsyncpa [#allocation3], 1 }
 0x8a6   :  { %1814 = vsyncpa [#allocation3 + $0x1], 1 }

</bundles_post_ra>
